<compile_context>
chip_gen: v7x
topology: tpu7x:2x2x1
jax: 0.10.0
libtpu: 0.0.40
codegen_flags: <defaults>
</compile_context>

<pallas_src>
import jax
import jax.numpy as jnp
from jax.experimental import pallas as pl
from jax.experimental.pallas import tpu as pltpu

H1 = 1024
H2 = 512
EPS = 1e-5
LANES = 128

# Keep the resident working set comfortably under v7x's 64 MiB physical VMEM.
_VMEM_SAFE_BYTES = 48 << 20


def _round_up(x, m):
    return (x + m - 1) // m * m


def _vmem_estimate(tb, inp_p, out_p):
    """Rough VMEM footprint for one batch tile (x/out double-buffered,
    weights single-buffered via pl.Buffered(1), plus f32/bf16 intermediates)."""
    x_bytes = 2 * tb * inp_p * 4                      # f32 input tile, 2 buffers
    o_bytes = 2 * tb * out_p * 4                      # f32 output tile, 2 buffers
    w_bytes = (inp_p * H1 + H1 * H2 + H2 * out_p) * 2 \
        + (H1 + H2 + out_p) * 4                        # bf16 weights + f32 shifts
    scratch = tb * (inp_p * 2 + H1 * 6 + H2 * 6 + out_p * 4)  # casts + f32 acc
    return x_bytes + o_bytes + w_bytes + scratch


def _choose_batch_tile(B, inp_p, out_p, tile_b):
    """Pick (tb, Bp): big tiles amortize the ~0.35us per-grid-step overhead,
    but keep grid >= 2 when it costs no extra padding (v7x megacore), and
    never exceed the safe VMEM budget."""
    Bp8 = _round_up(B, 8)
    if Bp8 <= 256:
        return Bp8, Bp8                               # tiny batch: single block

    cands = {min(tile_b, _round_up(-(-Bp8 // 2), 8))}  # two-way split
    t = 256
    while t <= min(tile_b, Bp8):
        cands.add(t)
        t *= 2
    if Bp8 <= tile_b:
        cands.add(Bp8)                                 # single big block

    best_key, best = None, None
    for tb in cands:
        Bp = _round_up(B, tb)
        grid = Bp // tb
        pad = Bp - B
        fits = _vmem_estimate(tb, inp_p, out_p) <= _VMEM_SAFE_BYTES
        # prefer: fits VMEM, then grid >= 2 (both TCs busy), then least row
        # padding, then the biggest tile (fewest grid steps).
        key = (not fits, grid < 2, pad, -tb)
        if best_key is None or key < best_key:
            best_key, best = key, (tb, Bp)
    return best


def _mlp_kernel(x_ref, w1_ref, t1_ref, w2_ref, t2_ref, w3_ref, b3_ref, o_ref):
    # Cast the f32 input tile to bf16 in-kernel (VPU cast hides under the MXU;
    # avoids a separate HBM cast pass in the wrapper).
    x = x_ref[...].astype(jnp.bfloat16)
    # Layer 1: Linear with BN scale folded into W1, BN shift + bias in t1, ReLU.
    h1 = jnp.dot(x, w1_ref[...], preferred_element_type=jnp.float32)
    h1 = jnp.maximum(h1 + t1_ref[...], 0.0).astype(jnp.bfloat16)
    # Layer 2: same fusion.
    h2 = jnp.dot(h1, w2_ref[...], preferred_element_type=jnp.float32)
    h2 = jnp.maximum(h2 + t2_ref[...], 0.0).astype(jnp.bfloat16)
    # Layer 3: plain Linear into a lane-dense (multiple-of-128) output slab.
    o_ref[...] = (jnp.dot(h2, w3_ref[...], preferred_element_type=jnp.float32)
                  + b3_ref[...])


def mlp_classification_forward(x, params, out_size, *, tile_b=1024):
    """x: (B, inp_size) f32. params: folded/bf16 params. Returns (B, out_size) f32."""
    B, inp_size = x.shape
    w1, t1, w2, t2, w3, b3 = params
    inp_p = w1.shape[0]                      # padded input width (multiple of 128)
    out_p = w3.shape[1]                      # padded output width (lane-dense)

    tb, Bp = _choose_batch_tile(B, inp_p, out_p, tile_b)

    # Zero-pad batch rows / input lanes only when needed, keeping f32 (the bf16
    # cast happens inside the kernel so x crosses HBM exactly once).
    if Bp != B or inp_p != inp_size:
        x = jnp.pad(x, ((0, Bp - B), (0, inp_p - inp_size)))

    grid = (Bp // tb,)
    vmem_limit = min(max(int(1.25 * _vmem_estimate(tb, inp_p, out_p)), 32 << 20),
                     60 << 20)

    flops = 2 * Bp * (inp_p * H1 + H1 * H2 + H2 * out_p)
    bytes_accessed = (Bp * inp_p * 4
                      + (w1.size + w2.size + w3.size) * 2
                      + (t1.size + t2.size + b3.size) * 4
                      + Bp * out_p * 4)

    # Grid-invariant operands: single-buffer them (constant index_map => double
    # buffering only doubles their VMEM footprint).
    const = dict(pipeline_mode=pl.Buffered(1))

    out = pl.pallas_call(
        _mlp_kernel,
        out_shape=jax.ShapeDtypeStruct((Bp, out_p), jnp.float32),
        grid_spec=pltpu.PrefetchScalarGridSpec(
            num_scalar_prefetch=0,
            grid=grid,
            in_specs=[
                pl.BlockSpec((tb, inp_p), lambda i: (i, 0)),            # x tile (f32)
                pl.BlockSpec((inp_p, H1), lambda i: (0, 0), **const),   # W1' (bf16)
                pl.BlockSpec((1, H1),     lambda i: (0, 0), **const),   # shift1 (f32)
                pl.BlockSpec((H1, H2),    lambda i: (0, 0), **const),   # W2' (bf16)
                pl.BlockSpec((1, H2),     lambda i: (0, 0), **const),   # shift2 (f32)
                pl.BlockSpec((H2, out_p), lambda i: (0, 0), **const),   # W3 padded (bf16)
                pl.BlockSpec((1, out_p),  lambda i: (0, 0), **const),   # b3 padded (f32)
            ],
            out_specs=pl.BlockSpec((tb, out_p), lambda i: (i, 0)),
        ),
        compiler_params=pltpu.CompilerParams(
            dimension_semantics=("parallel",),
            vmem_limit_bytes=vmem_limit),
        cost_estimate=pl.CostEstimate(flops=flops, transcendentals=0,
                                      bytes_accessed=bytes_accessed),
    )(x, w1, t1, w2, t2, w3, b3)

    # Strip batch and lane padding (free layout plumbing in plain JAX).
    return out[:B, :out_size]


def fold_params(raw):
    """Fold BN(eval) + biases into bf16 weights / f32 shifts; pad input to 128
    lanes and the output to 128 (256 when out_size > 128) lanes."""
    (w1, b1, w2, b2, w3, b3, g1, be1, rm1, rv1, g2, be2, rm2, rv2) = raw

    s1 = g1 / jnp.sqrt(rv1 + EPS)
    t1 = (b1 - rm1) * s1 + be1
    s2 = g2 / jnp.sqrt(rv2 + EPS)
    t2 = (b2 - rm2) * s2 + be2

    # torch Linear stores (out,in); transpose to (in,out), fold BN scale into
    # the columns in f32, then cast to bf16 for the MXU.
    inp_size = w1.shape[1]
    inp_p = _round_up(inp_size, LANES)
    w1p = jnp.zeros((inp_p, H1), jnp.float32).at[:inp_size, :].set(w1.T * s1[None, :])
    w1p = w1p.astype(jnp.bfloat16)
    w2p = (w2.T * s2[None, :]).astype(jnp.bfloat16)

    out_size = w3.shape[0]
    out_p = _round_up(out_size, 256 if out_size > 128 else LANES)
    w3p = jnp.zeros((H2, out_p), jnp.float32).at[:, :out_size].set(w3.T)
    w3p = w3p.astype(jnp.bfloat16)
    b3p = jnp.zeros((1, out_p), jnp.float32).at[0, :out_size].set(b3)

    return (w1p, t1[None, :].astype(jnp.float32),
            w2p, t2[None, :].astype(jnp.float32),
            w3p, b3p)


def make_params(key, inp_size, out_size):
    """Deterministic synthetic parameters (shapes from the module __init__)."""
    ks = jax.random.split(key, 14)
    initrange = 0.1

    def uni(k, shape):
        return jax.random.uniform(k, shape, jnp.float32, -initrange, initrange)

    w1 = uni(ks[0], (H1, inp_size)); b1 = uni(ks[1], (H1,))
    w2 = uni(ks[2], (H2, H1));       b2 = uni(ks[3], (H2,))
    w3 = uni(ks[4], (out_size, H2)); b3 = uni(ks[5], (out_size,))

    # BatchNorm1d parameters + running stats (eval mode), non-trivial values.
    g1 = 1.0 + 0.1 * jax.random.normal(ks[6], (H1,), jnp.float32)
    be1 = 0.1 * jax.random.normal(ks[7], (H1,), jnp.float32)
    rm1 = 0.1 * jax.random.normal(ks[8], (H1,), jnp.float32)
    rv1 = 1.0 + 0.1 * jax.random.uniform(ks[9], (H1,), jnp.float32)

    g2 = 1.0 + 0.1 * jax.random.normal(ks[10], (H2,), jnp.float32)
    be2 = 0.1 * jax.random.normal(ks[11], (H2,), jnp.float32)
    rm2 = 0.1 * jax.random.normal(ks[12], (H2,), jnp.float32)
    rv2 = 1.0 + 0.1 * jax.random.uniform(ks[13], (H2,), jnp.float32)

    raw = (w1, b1, w2, b2, w3, b3, g1, be1, rm1, rv1, g2, be2, rm2, rv2)
    return fold_params(raw), raw


def reference_forward(x, raw):
    """Pure-JAX f32 reference matching the PyTorch module in eval mode."""
    (w1, b1, w2, b2, w3, b3, g1, be1, rm1, rv1, g2, be2, rm2, rv2) = raw
    h = x @ w1.T + b1
    h = (h - rm1) / jnp.sqrt(rv1 + EPS) * g1 + be1
    h = jnp.maximum(h, 0.0)                      # dropout: identity in eval
    h = h @ w2.T + b2
    h = (h - rm2) / jnp.sqrt(rv2 + EPS) * g2 + be2
    h = jnp.maximum(h, 0.0)
    return h @ w3.T + b3


if __name__ == "__main__":
    INP, OUT = 256, 16
    key = jax.random.PRNGKey(0)
    kx1, kx2, kp = jax.random.split(key, 3)
    params, raw = make_params(kp, INP, OUT)

    # Tiny serving batch: single block (weight-DMA bound; see TODO above).
    x_small = jax.random.normal(kx1, (8, INP), jnp.float32)
    out_small = jax.block_until_ready(mlp_classification_forward(x_small, params, OUT))
    ref_small = reference_forward(x_small, raw)
    assert out_small.shape == (8, OUT)
    # bf16 weights + f32 accumulation vs pure-f32 reference -> bf16-sized tolerance.
    assert jnp.allclose(out_small, ref_small, atol=5e-2, rtol=5e-2), "mismatch (B=8)"

    # Larger batch: exercises the two-block grid (megacore) + row-padding path.
    x_big = jax.random.normal(kx2, (300, INP), jnp.float32)
    out_big = jax.block_until_ready(mlp_classification_forward(x_big, params, OUT))
    ref_big = reference_forward(x_big, raw)
    assert out_big.shape == (300, OUT)
    assert jnp.allclose(out_big, ref_big, atol=5e-2, rtol=5e-2), "mismatch (B=300)"

    print("KERNEL_OK")
</pallas_src>

<mosaic_0001>
module attributes {stable_mosaic.version = 11 : i64} {
  func.func @_mlp_kernel(%arg0: i32, %arg1: memref<8x256xf32, #tpu.memory_space<vmem>>, %arg2: memref<256x1024xbf16, #tpu.memory_space<vmem>>, %arg3: memref<1x1024xf32, #tpu.memory_space<vmem>>, %arg4: memref<1024x512xbf16, #tpu.memory_space<vmem>>, %arg5: memref<1x512xf32, #tpu.memory_space<vmem>>, %arg6: memref<512x128xbf16, #tpu.memory_space<vmem>>, %arg7: memref<1x128xf32, #tpu.memory_space<vmem>>, %arg8: memref<8x128xf32, #tpu.memory_space<vmem>>) attributes {dimension_semantics = [#tpu.dimension_semantics<parallel>], iteration_bounds = array<i64: 1>, scalar_prefetch = 0 : i64, scratch_operands = 0 : i64, tpu.core_type = #tpu.core_type<tc>, window_params = [{transform_indices = @transform_0, window_bounds = array<i64: 8, 256>}, {pipeline_mode = #tpu.pipeline_mode<synchronous>, transform_indices = @transform_1, window_bounds = array<i64: 256, 1024>}, {pipeline_mode = #tpu.pipeline_mode<synchronous>, transform_indices = @transform_2, window_bounds = array<i64: 1, 1024>}, {pipeline_mode = #tpu.pipeline_mode<synchronous>, transform_indices = @transform_3, window_bounds = array<i64: 1024, 512>}, {pipeline_mode = #tpu.pipeline_mode<synchronous>, transform_indices = @transform_4, window_bounds = array<i64: 1, 512>}, {pipeline_mode = #tpu.pipeline_mode<synchronous>, transform_indices = @transform_5, window_bounds = array<i64: 512, 128>}, {pipeline_mode = #tpu.pipeline_mode<synchronous>, transform_indices = @transform_6, window_bounds = array<i64: 1, 128>}, {transform_indices = @transform_7, window_bounds = array<i64: 8, 128>}]} {
    %c0 = arith.constant 0 : index
    %c0_0 = arith.constant 0 : index
    %0 = vector.load %arg1[%c0, %c0_0] : memref<8x256xf32, #tpu.memory_space<vmem>>, vector<8x256xf32>
    %1 = arith.truncf %0 : vector<8x256xf32> to vector<8x256xbf16>
    %c0_1 = arith.constant 0 : index
    %c0_2 = arith.constant 0 : index
    %2 = vector.load %arg2[%c0_1, %c0_2] : memref<256x1024xbf16, #tpu.memory_space<vmem>>, vector<256x1024xbf16>
    %cst = arith.constant dense<0.000000e+00> : vector<8x1024xf32>
    %3 = tpu.matmul %1, %2, %cst {dimension_numbers = #tpu.dot_dimension_numbers<[1], [0], [0], [1], [0, 0, 1, 1], [], []>} : vector<8x256xbf16>, vector<256x1024xbf16>, vector<8x1024xf32> -> vector<8x1024xf32>
    %c0_3 = arith.constant 0 : index
    %c0_4 = arith.constant 0 : index
    %4 = vector.load %arg3[%c0_3, %c0_4] : memref<1x1024xf32, #tpu.memory_space<vmem>>, vector<1x1024xf32>
    %5 = vector.broadcast %4 : vector<1x1024xf32> to vector<8x1024xf32>
    %6 = arith.addf %3, %5 : vector<8x1024xf32>
    %cst_5 = arith.constant 0.000000e+00 : f32
    %7 = vector.broadcast %cst_5 : f32 to vector<8x1024xf32>
    %8 = arith.maximumf %6, %7 : vector<8x1024xf32>
    %9 = arith.truncf %8 : vector<8x1024xf32> to vector<8x1024xbf16>
    %c0_6 = arith.constant 0 : index
    %c0_7 = arith.constant 0 : index
    %10 = vector.load %arg4[%c0_6, %c0_7] : memref<1024x512xbf16, #tpu.memory_space<vmem>>, vector<1024x512xbf16>
    %cst_8 = arith.constant dense<0.000000e+00> : vector<8x512xf32>
    %11 = tpu.matmul %9, %10, %cst_8 {dimension_numbers = #tpu.dot_dimension_numbers<[1], [0], [0], [1], [0, 0, 1, 1], [], []>} : vector<8x1024xbf16>, vector<1024x512xbf16>, vector<8x512xf32> -> vector<8x512xf32>
    %c0_9 = arith.constant 0 : index
    %c0_10 = arith.constant 0 : index
    %12 = vector.load %arg5[%c0_9, %c0_10] : memref<1x512xf32, #tpu.memory_space<vmem>>, vector<1x512xf32>
    %13 = vector.broadcast %12 : vector<1x512xf32> to vector<8x512xf32>
    %14 = arith.addf %11, %13 : vector<8x512xf32>
    %cst_11 = arith.constant 0.000000e+00 : f32
    %15 = vector.broadcast %cst_11 : f32 to vector<8x512xf32>
    %16 = arith.maximumf %14, %15 : vector<8x512xf32>
    %17 = arith.truncf %16 : vector<8x512xf32> to vector<8x512xbf16>
    %c0_12 = arith.constant 0 : index
    %c0_13 = arith.constant 0 : index
    %18 = vector.load %arg6[%c0_12, %c0_13] : memref<512x128xbf16, #tpu.memory_space<vmem>>, vector<512x128xbf16>
    %cst_14 = arith.constant dense<0.000000e+00> : vector<8x128xf32>
    %19 = tpu.matmul %17, %18, %cst_14 {dimension_numbers = #tpu.dot_dimension_numbers<[1], [0], [0], [1], [0, 0, 1, 1], [], []>} : vector<8x512xbf16>, vector<512x128xbf16>, vector<8x128xf32> -> vector<8x128xf32>
    %c0_15 = arith.constant 0 : index
    %c0_16 = arith.constant 0 : index
    %20 = vector.load %arg7[%c0_15, %c0_16] : memref<1x128xf32, #tpu.memory_space<vmem>>, vector<1x128xf32>
    %21 = vector.broadcast %20 : vector<1x128xf32> to vector<8x128xf32>
    %22 = arith.addf %19, %21 : vector<8x128xf32>
    %c0_17 = arith.constant 0 : index
    %c0_18 = arith.constant 0 : index
    %23 = vector.load %arg8[%c0_17, %c0_18] : memref<8x128xf32, #tpu.memory_space<vmem>>, vector<8x128xf32>
    tpu.vector_store %arg8[%c0_17, %c0_18], %22 {strides = array<i32>} : memref<8x128xf32, #tpu.memory_space<vmem>>, vector<8x128xf32>,
    return
  }
  func.func @transform_0(%arg0: i32) -> (i32, i32) {
    %c0_i32 = arith.constant 0 : i32
    %c0_i32_0 = arith.constant 0 : i32
    return %arg0, %c0_i32 : i32, i32
  }
  func.func @transform_1(%arg0: i32) -> (i32, i32) {
    %c0_i32 = arith.constant 0 : i32
    %c0_i32_0 = arith.constant 0 : i32
    %c0_i32_1 = arith.constant 0 : i32
    return %c0_i32, %c0_i32_0 : i32, i32
  }
  func.func @transform_2(%arg0: i32) -> (i32, i32) {
    %c0_i32 = arith.constant 0 : i32
    %c0_i32_0 = arith.constant 0 : i32
    %c0_i32_1 = arith.constant 0 : i32
    return %c0_i32, %c0_i32_0 : i32, i32
  }
  func.func @transform_3(%arg0: i32) -> (i32, i32) {
    %c0_i32 = arith.constant 0 : i32
    %c0_i32_0 = arith.constant 0 : i32
    %c0_i32_1 = arith.constant 0 : i32
    return %c0_i32, %c0_i32_0 : i32, i32
  }
  func.func @transform_4(%arg0: i32) -> (i32, i32) {
    %c0_i32 = arith.constant 0 : i32
    %c0_i32_0 = arith.constant 0 : i32
    %c0_i32_1 = arith.constant 0 : i32
    return %c0_i32, %c0_i32_0 : i32, i32
  }
  func.func @transform_5(%arg0: i32) -> (i32, i32) {
    %c0_i32 = arith.constant 0 : i32
    %c0_i32_0 = arith.constant 0 : i32
    %c0_i32_1 = arith.constant 0 : i32
    return %c0_i32, %c0_i32_0 : i32, i32
  }
  func.func @transform_6(%arg0: i32) -> (i32, i32) {
    %c0_i32 = arith.constant 0 : i32
    %c0_i32_0 = arith.constant 0 : i32
    %c0_i32_1 = arith.constant 0 : i32
    return %c0_i32, %c0_i32_0 : i32, i32
  }
  func.func @transform_7(%arg0: i32) -> (i32, i32) {
    %c0_i32 = arith.constant 0 : i32
    %c0_i32_0 = arith.constant 0 : i32
    return %arg0, %c0_i32 : i32, i32
  }
}

</mosaic_0001>

<bundles_post_ra>
// kernel: tpu_custom_call.1
= control target key start
LH: loop header
LB: loop body
LE: loop exit
PB: predicated region body
PF: predicated region fallthrough
CT: control target
= control target key end

     0   :  { %12 = vsyncpa [#allocation3], 0  ;;  %s4588_s0 = inlined_call_operand.hbm [shape: f32[8,256], index: 0, kind: input, shape index: {}]   ;;  %s4589_s1 = inlined_call_operand.hbm [shape: bf16[256,1024], index: 1, kind: input, shape index: {}]   ;;  %s4590_s2 = inlined_call_operand.hbm [shape: f32[1,1024], index: 2, kind: input, shape index: {}]   ;;  %s4591_s3 = inlined_call_operand.hbm [shape: bf16[1024,512], index: 3, kind: input, shape index: {}]   ;;  %s4592_s4 = inlined_call_operand.vmem [shape: f32[1,512], index: 4, kind: input, shape index: {}]   ;;  %s4593_s5 = inlined_call_operand.hbm [shape: bf16[512,128], index: 5, kind: input, shape index: {}]   ;;  %s4594_s6 = inlined_call_operand.vmem [shape: f32[1,128], index: 6, kind: input, shape index: {}]   ;;  %s4595_s7 = inlined_call_operand.hbm [shape: f32[8,128], index: 7, kind: output, shape index: {}]  }
   0x1   :  { %13 = vsyncpa [#allocation6], 0 }
   0x2   :  { %14 = vsyncpa [#allocation9], 0 }
   0x3   :  { %15 = vsyncpa [#allocation4], 0  ;;  %s4398_s24 = smov [#allocation5]   ;;  %s4258_s28 = scalar_lea.hbm %s4589_s1, 16384 }
   0x4   :  { %s31_s25 = sshll.u32 %s4398_s24, 4  ;;  %p4259_p0 = scmp.ne.s32.totalorder %s4589_s1, %s4258_s28  ;;  %s32_s25 = int_to_ptr.vmem [resolvable:$true] %s31_s25 }
   0x5   :  { %p4262_p1 = scmp.lt.u32.totalorder %s4258_s28, %s4589_s1 }
   0x7   :  { %p4264_p2 = pnand %p4262_p1, %p4259_p0 }
   0x9   :  { %4267 = shalt.err (!%p4264_p2)
}
   0xa   :  { %s4268_s10 = scalar_lea.vmem %s32_s25, 16384  ;;  %p4273_p4 = scmp.lt.s32.totalorder %s32_s25, %s32_s25 }
   0xb   :  { %p4269_p3 = scmp.ne.s32.totalorder %s32_s25, %s4268_s10  ;;  %p4274_p5 = scmp.lt.s32.totalorder %s4268_s10, %s4268_s10 }
   0xd   :  { %p4275_p6 = por %p4274_p5, %p4273_p4 }
   0xf   :  { %p4276_p7 = pnand %p4275_p6, %p4269_p3 }
  0x11   :  { %4279 = shalt.err (!%p4276_p7)
}
  0x12   :  { %s4399_s11 = smov 512   ;;  %s4400_s12 = smov 32  }
  0x13   :  { %37 = dma.hbm_to_vmem [thread:$0]  %s4589_s1, 16384, %s32_s25, [#allocation6], %s4399_s11, %s4399_s11, %s4400_s12  }
  0x14   :  { %s4401_s15 = smov [#allocation8]   ;;  %s4280_s19 = scalar_lea.hbm %s4591_s3, 32768 }
  0x15   :  { %s53_s16 = sshll.u32 %s4401_s15, 4  ;;  %p4281_p8 = scmp.ne.s32.totalorder %s4591_s3, %s4280_s19  ;;  %s54_s16 = int_to_ptr.vmem [resolvable:$true] %s53_s16 }
  0x16   :  { %p4284_p9 = scmp.lt.u32.totalorder %s4280_s19, %s4591_s3 }
  0x18   :  { %p4286_p10 = pnand %p4284_p9, %p4281_p8 }
  0x1a   :  { %4289 = shalt.err (!%p4286_p10)
}
  0x1b   :  { %s4290_s24 = scalar_lea.vmem %s54_s16, 32768  ;;  %p4295_p12 = scmp.lt.s32.totalorder %s54_s16, %s54_s16 }
  0x1c   :  { %p4291_p11 = scmp.ne.s32.totalorder %s54_s16, %s4290_s24  ;;  %p4296_p13 = scmp.lt.s32.totalorder %s4290_s24, %s4290_s24 }
  0x1e   :  { %p4297_p0 = por %p4296_p13, %p4295_p12 }
  0x20   :  { %p4298_p1 = pnand %p4297_p0, %p4291_p11 }
  0x22   :  { %4301 = shalt.err (!%p4298_p1)
}
  0x23   :  { %s4402_s1 = smov 256   ;;  %s4403_s25 = smov 16  }
  0x24   :  { %59 = dma.hbm_to_vmem [thread:$0]  %s4591_s3, 32768, %s54_s16, [#allocation9], %s4402_s1, %s4402_s1, %s4403_s25  }
  0x25   :  { %s4404_s28 = smov [#allocation2]   ;;  %s4405_s30 = smov [#allocation7]  }
  0x26   :  { %s22_s29 = sshll.u32 %s4404_s28, 4  ;;  %s44_s8 = sshll.u32 %s4405_s30, 4  ;;  %s23_s29 = int_to_ptr.vmem [resolvable:$true] %s22_s29  ;;  %s45_s8 = int_to_ptr.vmem [resolvable:$true] %s44_s8 }
  0x27   :  { %s4302_s11 = scalar_lea.hbm %s4588_s0, 256 }
  0x28   :  { %p4303_p2 = scmp.ne.s32.totalorder %s4588_s0, %s4302_s11  ;;  %p4306_p3 = scmp.lt.u32.totalorder %s4302_s11, %s4588_s0 }
  0x2a   :  { %p4308_p4 = pnand %p4306_p3, %p4303_p2 }
  0x2c   :  { %4311 = shalt.err (!%p4308_p4)
}
  0x2d   :  { %s4312_s3 = scalar_lea.vmem %s23_s29, 256  ;;  %p4317_p6 = scmp.lt.s32.totalorder %s23_s29, %s23_s29 }
  0x2e   :  { %p4313_p5 = scmp.ne.s32.totalorder %s23_s29, %s4312_s3  ;;  %p4318_p7 = scmp.lt.s32.totalorder %s4312_s3, %s4312_s3 }
  0x30   :  { %p4319_p8 = por %p4318_p7, %p4317_p6 }
  0x32   :  { %p4320_p9 = pnand %p4319_p8, %p4313_p5 }
  0x34   :  { %4323 = shalt.err (!%p4320_p9)
}
  0x35   :  { %25 = dma.hbm_to_vmem [thread:$0]  %s4588_s0, 256, %s23_s29, [#allocation3]  }
  0x36   :  { %s4324_s20 = scalar_lea.hbm %s4590_s2, 128 }
  0x37   :  { %p4325_p10 = scmp.ne.s32.totalorder %s4590_s2, %s4324_s20  ;;  %p4328_p11 = scmp.lt.u32.totalorder %s4324_s20, %s4590_s2 }
  0x39   :  { %p4330_p12 = pnand %p4328_p11, %p4325_p10 }
  0x3b   :  { %4333 = shalt.err (!%p4330_p12)
}
  0x3c   :  { %s4334_s1 = scalar_lea.vmem %s45_s8, 128  ;;  %p4339_p0 = scmp.lt.s32.totalorder %s45_s8, %s45_s8 }
  0x3d   :  { %p4335_p13 = scmp.ne.s32.totalorder %s45_s8, %s4334_s1  ;;  %p4340_p1 = scmp.lt.s32.totalorder %s4334_s1, %s4334_s1 }
  0x3f   :  { %p4341_p2 = por %p4340_p1, %p4339_p0 }
  0x41   :  { %p4342_p3 = pnand %p4341_p2, %p4335_p13 }
  0x43   :  { %4345 = shalt.err (!%p4342_p3)
}
  0x44   :  { %47 = dma.hbm_to_vmem [thread:$0]  %s4590_s2, 128, %s45_s8, [#allocation6]  }
  0x45   :  { %s4406_s26 = smov [#allocation10]   ;;  %s4346_s30 = scalar_lea.hbm %s4593_s5, 4096 }
  0x46   :  { %s67_s27 = sshll.u32 %s4406_s26, 4  ;;  %p4347_p4 = scmp.ne.s32.totalorder %s4593_s5, %s4346_s30  ;;  %s68_s27 = int_to_ptr.vmem [resolvable:$true] %s67_s27 }
  0x47   :  { %p4350_p5 = scmp.lt.u32.totalorder %s4346_s30, %s4593_s5 }
  0x49   :  { %p4352_p6 = pnand %p4350_p5, %p4347_p4 }
  0x4b   :  { %4355 = shalt.err (!%p4352_p6)
}
  0x4c   :  { %s4356_s13 = scalar_lea.vmem %s68_s27, 4096  ;;  %p4361_p8 = scmp.lt.s32.totalorder %s68_s27, %s68_s27 }
  0x4d   :  { %p4357_p7 = scmp.ne.s32.totalorder %s68_s27, %s4356_s13  ;;  %p4362_p9 = scmp.lt.s32.totalorder %s4356_s13, %s4356_s13 }
  0x4f   :  { %p4363_p10 = por %p4362_p9, %p4361_p8 }
  0x51   :  { %p4364_p11 = pnand %p4363_p10, %p4357_p7 }
  0x53   :  { %4367 = shalt.err (!%p4364_p11)
}
  0x54   :  { %s4407_s2 = smov 64   ;;  %s4408_s8 = smov 4  }
  0x55   :  { %73 = dma.hbm_to_vmem [thread:$0]  %s4593_s5, 4096, %s68_s27, [#allocation9], %s4407_s2, %s4407_s2, %s4408_s8  }
  0x56   :  { %4390 = dma.done.wait [#allocation3], 256  }
  0x57   :  { %4391 = vsyncadd [#allocation3], 4294967040 }
  0x58   :  { %4392 = dma.done.wait [#allocation6], 16512  }
  0x59   :  { %4393 = vsyncadd [#allocation6], 4294950784 }
  0x5a   :  { %4394 = dma.done.wait [#allocation9], 36864  }
  0x5b   :  { %4395 = vsyncadd [#allocation9], 4294930432  ;;  %v96_v0 = vld [vmem:[#allocation5] sm:$0xff]  ;;  %v97_v17 = vld [vmem:[#allocation5 + $0x8] sm:$0xff]  ;;  %s4409_s17 = smov [#allocation11]  }
  0x5c   :  { %v100_v1 = vld [vmem:[#allocation5 + $0x20] sm:$0xff]  ;;  %v101_v18 = vld [vmem:[#allocation5 + $0x28] sm:$0xff]  ;;  %v93_v19 = vld [vmem:[#allocation2 + $0x8] sm:$0xff]  ;;  %s3330_s18 = sshll.u32 %s4409_s17, 4  ;;  %s3331_s18 = int_to_ptr.vmem [resolvable:$true] %s3330_s18 }
  0x5d   :  { %v104_v2 = vld [vmem:[#allocation5 + $0x40] sm:$0xff]  ;;  %v3342_v3 = vcombine.high %v96_v0, %v100_v1  ;;  %v3341_v4 = vcombine.low %v96_v0, %v100_v1  ;;  %v3344_v21 = vcombine.high %v97_v17, %v101_v18  ;;  %v3343_v22 = vcombine.low %v97_v17, %v101_v18  ;;  %v105_v24 = vld [vmem:[#allocation5 + $0x48] sm:$0xff]  ;;  %s4368_s19 = scalar_lea.vmem %s3331_s18, 128  ;;  %p4373_p13 = scmp.lt.s32.totalorder %s3331_s18, %s3331_s18 }
  0x5e   :  { %v108_v5 = vld [vmem:[#allocation5 + $0x60] sm:$0xff]  ;;  %v4510_v23 = vpack.c.bf16 %v93_v19, %v93_v19  ;;  %v109_v25 = vld [vmem:[#allocation5 + $0x68] sm:$0xff]  ;;  %p4369_p12 = scmp.ne.s32.totalorder %s3331_s18, %s4368_s19  ;;  %p4374_p0 = scmp.lt.s32.totalorder %s4368_s19, %s4368_s19 }
  0x5f   :  { %v3350_v6 = vcombine.high %v104_v2, %v108_v5  ;;  %v112_v7 = vld [vmem:[#allocation5 + $0x80] sm:$0xff]  ;;  %906 = vmatprep.subr.bf16.mxu0 %v3342_v3  ;;  %v3349_v9 = vcombine.low %v104_v2, %v108_v5  ;;  %v3352_v27 = vcombine.high %v105_v24, %v109_v25  ;;  %v113_v28 = vld [vmem:[#allocation5 + $0x88] sm:$0xff]  ;;  %947 = vmatprep.subr.bf16.mxu1 %v3344_v21 }
  0x60   :  { %v116_v8 = vld [vmem:[#allocation5 + $0xa0] sm:$0xff]  ;;  %907 = vmatpush1.bf16.msra.mxu0 %v3341_v4  ;;  %v117_v29 = vld [vmem:[#allocation5 + $0xa8] sm:$0xff]  ;;  %938 = vmatprep.mubr.bf16.mxu0 %v4510_v23  ;;  %v3351_v32 = vcombine.low %v105_v24, %v109_v25  ;;  %p4375_p1 = por %p4374_p0, %p4373_p13 }
  0x61   :  { %908 = vmatprep.subr.bf16.mxu0 %v3350_v6  ;;  %v3358_v10 = vcombine.high %v112_v7, %v116_v8  ;;  %v120_v11 = vld [vmem:[#allocation5 + $0xc0] sm:$0xff]  ;;  %v3357_v13 = vcombine.low %v112_v7, %v116_v8  ;;  %948 = vmatpush1.bf16.msra.mxu1 %v3343_v22  ;;  %v3360_v34 = vcombine.high %v113_v28, %v117_v29  ;;  %v121_v36 = vld [vmem:[#allocation5 + $0xc8] sm:$0xff] }
  0x62   :  { %v124_v12 = vld [vmem:[#allocation5 + $0xe0] sm:$0xff]  ;;  %979 = vmatprep.mubr.bf16.mxu1 %v4510_v23  ;;  %949 = vmatprep.subr.bf16.mxu1 %v3352_v27  ;;  %v125_v37 = vld [vmem:[#allocation5 + $0xe8] sm:$0xff]  ;;  %v3359_v40 = vcombine.low %v113_v28, %v117_v29  ;;  %p4376_p2 = pnand %p4375_p1, %p4369_p12 }
  0x63   :  { %v3366_v14 = vcombine.high %v120_v11, %v124_v12  ;;  %v128_v15 = vld [vmem:[#allocation5 + $0x100] sm:$0xff]  ;;  %v3365_v20 = vcombine.low %v120_v11, %v124_v12  ;;  %v3368_v42 = vcombine.high %v121_v36, %v125_v37  ;;  %v129_v44 = vld [vmem:[#allocation5 + $0x108] sm:$0xff]  ;;  %v3367_v48 = vcombine.low %v121_v36, %v125_v37 }
  0x64   :  { %909 = vmatpush1.bf16.msra.mxu0 %v3349_v9  ;;  %v132_v16 = vld [vmem:[#allocation5 + $0x120] sm:$0xff]  ;;  %v133_v45 = vld [vmem:[#allocation5 + $0x128] sm:$0xff] }
  0x65   :  { %910 = vmatprep.subr.bf16.mxu0 %v3358_v10  ;;  %v3374_v26 = vcombine.high %v128_v15, %v132_v16  ;;  %v136_v30 = vld [vmem:[#allocation5 + $0x140] sm:$0xff]  ;;  %v3373_v33 = vcombine.low %v128_v15, %v132_v16  ;;  %950 = vmatpush1.bf16.msra.mxu1 %v3351_v32  ;;  %v3376_v50 = vcombine.high %v129_v44, %v133_v45  ;;  %v137_v52 = vld [vmem:[#allocation5 + $0x148] sm:$0xff] }
  0x66   :  { %v140_v31 = vld [vmem:[#allocation5 + $0x160] sm:$0xff]  ;;  %951 = vmatprep.subr.bf16.mxu1 %v3360_v34  ;;  %v141_v53 = vld [vmem:[#allocation5 + $0x168] sm:$0xff]  ;;  %v3375_v56 = vcombine.low %v129_v44, %v133_v45 }
  0x67   :  { %v3382_v35 = vcombine.high %v136_v30, %v140_v31  ;;  %v144_v38 = vld [vmem:[#allocation5 + $0x180] sm:$0xff]  ;;  %v3381_v41 = vcombine.low %v136_v30, %v140_v31  ;;  %v3384_v58 = vcombine.high %v137_v52, %v141_v53  ;;  %v145_v60 = vld [vmem:[#allocation5 + $0x188] sm:$0xff]  ;;  %v3383_v0 = vcombine.low %v137_v52, %v141_v53 }
  0x68   :  { %911 = vmatpush1.bf16.msra.mxu0 %v3357_v13  ;;  %v148_v39 = vld [vmem:[#allocation5 + $0x1a0] sm:$0xff]  ;;  %v149_v61 = vld [vmem:[#allocation5 + $0x1a8] sm:$0xff] }
  0x69   :  { %912 = vmatprep.subr.bf16.mxu0 %v3366_v14  ;;  %v3390_v43 = vcombine.high %v144_v38, %v148_v39  ;;  %v152_v46 = vld [vmem:[#allocation5 + $0x1c0] sm:$0xff]  ;;  %952 = vmatpush1.bf16.msra.mxu1 %v3359_v40  ;;  %v3389_v49 = vcombine.low %v144_v38, %v148_v39  ;;  %v3392_v2 = vcombine.high %v145_v60, %v149_v61  ;;  %v153_v4 = vld [vmem:[#allocation5 + $0x1c8] sm:$0xff] }
  0x6a   :  { %v156_v47 = vld [vmem:[#allocation5 + $0x1e0] sm:$0xff]  ;;  %953 = vmatprep.subr.bf16.mxu1 %v3368_v42  ;;  %v157_v5 = vld [vmem:[#allocation5 + $0x1e8] sm:$0xff]  ;;  %v3391_v8 = vcombine.low %v145_v60, %v149_v61 }
  0x6b   :  { %v3398_v51 = vcombine.high %v152_v46, %v156_v47  ;;  %v160_v54 = vld [vmem:[#allocation5 + $0x200] sm:$0xff]  ;;  %v3397_v57 = vcombine.low %v152_v46, %v156_v47  ;;  %v3400_v10 = vcombine.high %v153_v4, %v157_v5  ;;  %v161_v12 = vld [vmem:[#allocation5 + $0x208] sm:$0xff]  ;;  %v3399_v16 = vcombine.low %v153_v4, %v157_v5 }
  0x6c   :  { %913 = vmatpush1.bf16.msra.mxu0 %v3365_v20  ;;  %v164_v55 = vld [vmem:[#allocation5 + $0x220] sm:$0xff]  ;;  %v165_v13 = vld [vmem:[#allocation5 + $0x228] sm:$0xff] }
  0x6d   :  { %914 = vmatprep.subr.bf16.mxu0 %v3374_v26  ;;  %954 = vmatpush1.bf16.msra.mxu1 %v3367_v48  ;;  %v3406_v59 = vcombine.high %v160_v54, %v164_v55  ;;  %v168_v62 = vld [vmem:[#allocation5 + $0x240] sm:$0xff]  ;;  %v3405_v1 = vcombine.low %v160_v54, %v164_v55  ;;  %v3408_v18 = vcombine.high %v161_v12, %v165_v13  ;;  %v169_v20 = vld [vmem:[#allocation5 + $0x248] sm:$0xff]  ;;  %v98_v55 = vld [vmem:[#allocation5 + $0x10] sm:$0xff] }
  0x6e   :  { %955 = vmatprep.subr.bf16.mxu1 %v3376_v50  ;;  %v172_v63 = vld [vmem:[#allocation5 + $0x260] sm:$0xff]  ;;  %v173_v21 = vld [vmem:[#allocation5 + $0x268] sm:$0xff]  ;;  %v3407_v25 = vcombine.low %v161_v12, %v165_v13 }
  0x6f   :  { %v3414_v3 = vcombine.high %v168_v62, %v172_v63  ;;  %v176_v6 = vld [vmem:[#allocation5 + $0x280] sm:$0xff]  ;;  %v3413_v9 = vcombine.low %v168_v62, %v172_v63  ;;  %v3416_v28 = vcombine.high %v169_v20, %v173_v21  ;;  %v177_v30 = vld [vmem:[#allocation5 + $0x288] sm:$0xff] }
  0x70   :  { %915 = vmatpush1.bf16.msra.mxu0 %v3373_v33  ;;  %v180_v7 = vld [vmem:[#allocation5 + $0x2a0] sm:$0xff]  ;;  %v181_v31 = vld [vmem:[#allocation5 + $0x2a8] sm:$0xff]  ;;  %v3415_v33 = vcombine.low %v169_v20, %v173_v21  ;;  %v130_v21 = vld [vmem:[#allocation5 + $0x110] sm:$0xff] }
  0x71   :  { %916 = vmatprep.subr.bf16.mxu0 %v3382_v35  ;;  %956 = vmatpush1.bf16.msra.mxu1 %v3375_v56  ;;  %v3422_v11 = vcombine.high %v176_v6, %v180_v7  ;;  %v184_v14 = vld [vmem:[#allocation5 + $0x2c0] sm:$0xff]  ;;  %v3421_v17 = vcombine.low %v176_v6, %v180_v7  ;;  %v3424_v36 = vcombine.high %v177_v30, %v181_v31  ;;  %v185_v38 = vld [vmem:[#allocation5 + $0x2c8] sm:$0xff]  ;;  %v102_v56 = vld [vmem:[#allocation5 + $0x30] sm:$0xff] }
  0x72   :  { %957 = vmatprep.subr.bf16.mxu1 %v3384_v58  ;;  %v188_v15 = vld [vmem:[#allocation5 + $0x2e0] sm:$0xff]  ;;  %v189_v39 = vld [vmem:[#allocation5 + $0x2e8] sm:$0xff]  ;;  %v3346_v63 = vcombine.high %v98_v55, %v102_v56  ;;  %v3345_v6 = vcombine.low %v98_v55, %v102_v56  ;;  %v162_v55 = vld [vmem:[#allocation5 + $0x210] sm:$0xff] }
  0x73   :  { %v3430_v19 = vcombine.high %v184_v14, %v188_v15  ;;  %v192_v22 = vld [vmem:[#allocation5 + $0x300] sm:$0xff]  ;;  %v3429_v26 = vcombine.low %v184_v14, %v188_v15  ;;  %v3432_v44 = vcombine.high %v185_v38, %v189_v39  ;;  %v193_v46 = vld [vmem:[#allocation5 + $0x308] sm:$0xff]  ;;  %v122_v14 = vld [vmem:[#allocation5 + $0xd0] sm:$0xff] }
  0x74   :  { %917 = vmatpush1.bf16.msra.mxu0 %v3381_v41  ;;  %v196_v24 = vld [vmem:[#allocation5 + $0x320] sm:$0xff]  ;;  %v3423_v41 = vcombine.low %v177_v30, %v181_v31  ;;  %v197_v47 = vld [vmem:[#allocation5 + $0x328] sm:$0xff]  ;;  %v138_v30 = vld [vmem:[#allocation5 + $0x150] sm:$0xff] }
  0x75   :  { %918 = vmatprep.subr.bf16.mxu0 %v3390_v43  ;;  %958 = vmatpush1.bf16.msra.mxu1 %v3383_v0  ;;  %v200_v27 = vld [vmem:[#allocation5 + $0x340] sm:$0xff]  ;;  %v3438_v29 = vcombine.high %v192_v22, %v196_v24  ;;  %v3437_v34 = vcombine.low %v192_v22, %v196_v24  ;;  %v201_v52 = vld [vmem:[#allocation5 + $0x348] sm:$0xff]  ;;  %v106_v0 = vld [vmem:[#allocation5 + $0x50] sm:$0xff] }
  0x76   :  { %959 = vmatprep.subr.bf16.mxu1 %v3392_v2  ;;  %v204_v32 = vld [vmem:[#allocation5 + $0x360] sm:$0xff]  ;;  %v205_v54 = vld [vmem:[#allocation5 + $0x368] sm:$0xff]  ;;  %v166_v56 = vld [vmem:[#allocation5 + $0x230] sm:$0xff] }
  0x77   :  { %v208_v35 = vld [vmem:[#allocation5 + $0x380] sm:$0xff]  ;;  %v3446_v37 = vcombine.high %v200_v27, %v204_v32  ;;  %v3445_v42 = vcombine.low %v200_v27, %v204_v32  ;;  %v3448_v60 = vcombine.high %v201_v52, %v205_v54  ;;  %v209_v61 = vld [vmem:[#allocation5 + $0x388] sm:$0xff]  ;;  %v134_v27 = vld [vmem:[#allocation5 + $0x130] sm:$0xff] }
  0x78   :  { %919 = vmatpush1.bf16.msra.mxu0 %v3389_v49  ;;  %v212_v40 = vld [vmem:[#allocation5 + $0x3a0] sm:$0xff]  ;;  %v3431_v49 = vcombine.low %v185_v38, %v189_v39  ;;  %v213_v62 = vld [vmem:[#allocation5 + $0x3a8] sm:$0xff]  ;;  %v3378_v32 = vcombine.high %v130_v21, %v134_v27  ;;  %v146_v38 = vld [vmem:[#allocation5 + $0x190] sm:$0xff] }
  0x79   :  { %920 = vmatprep.subr.bf16.mxu0 %v3398_v51  ;;  %960 = vmatpush1.bf16.msra.mxu1 %v3391_v8  ;;  %v216_v43 = vld [vmem:[#allocation5 + $0x3c0] sm:$0xff]  ;;  %v3454_v45 = vcombine.high %v208_v35, %v212_v40  ;;  %v3453_v50 = vcombine.low %v208_v35, %v212_v40  ;;  %v3440_v51 = vcombine.high %v193_v46, %v197_v47  ;;  %v217_v5 = vld [vmem:[#allocation5 + $0x3c8] sm:$0xff]  ;;  %v142_v35 = vld [vmem:[#allocation5 + $0x170] sm:$0xff] }
  0x7a   :  { %961 = vmatprep.subr.bf16.mxu1 %v3400_v10  ;;  %v220_v48 = vld [vmem:[#allocation5 + $0x3e0] sm:$0xff]  ;;  %v3456_v4 = vcombine.high %v209_v61, %v213_v62  ;;  %v221_v7 = vld [vmem:[#allocation5 + $0x3e8] sm:$0xff]  ;;  %v118_v10 = vld [vmem:[#allocation5 + $0xb0] sm:$0xff] }
  0x7b   :  { %v3462_v53 = vcombine.high %v216_v43, %v220_v48  ;;  %v3461_v58 = vcombine.low %v216_v43, %v220_v48  ;;  %v3464_v12 = vcombine.high %v217_v5, %v221_v7  ;;  %v150_v39 = vld [vmem:[#allocation5 + $0x1b0] sm:$0xff]  ;;  %v3386_v43 = vcombine.high %v138_v30, %v142_v35 }
  0x7c   :  { %921 = vmatpush1.bf16.msra.mxu0 %v3397_v57  ;;  %v3439_v57 = vcombine.low %v193_v46, %v197_v47  ;;  %v135_v46 = vld [vmem:[#allocation5 + $0x138] sm:$0xff]  ;;  %v3385_v47 = vcombine.low %v138_v30, %v142_v35  ;;  %v154_v48 = vld [vmem:[#allocation5 + $0x1d0] sm:$0xff] }
  0x7d   :  { %922 = vmatprep.subr.bf16.mxu0 %v3406_v59  ;;  %962 = vmatpush1.bf16.msra.mxu1 %v3399_v16  ;;  %v92_v59 = vld [vmem:[#allocation2] sm:$0xff]  ;;  %v99_v16 = vld [vmem:[#allocation5 + $0x18] sm:$0xff] }
  0x7e   :  { %963 = vmatprep.subr.bf16.mxu1 %v3408_v18  ;;  %v4514_v2 = vpack.c.bf16 %v92_v59, %v92_v59  ;;  %v126_v18 = vld [vmem:[#allocation5 + $0xf0] sm:$0xff]  ;;  %v179_v30 = vld [vmem:[#allocation5 + $0x298] sm:$0xff] }
  0x7f   :  { %v3370_v24 = vcombine.high %v122_v14, %v126_v18 }
  0x80   :  { %923 = vmatpush1.bf16.msra.mxu0 %v3405_v1  ;;  %v110_v1 = vld [vmem:[#allocation5 + $0x70] sm:$0xff] }
  0x81   :  { %924 = vmatprep.subr.bf16.mxu0 %v3414_v3  ;;  %964 = vmatpush1.bf16.msra.mxu1 %v3407_v25  ;;  %v3447_v3 = vcombine.low %v201_v52, %v205_v54  ;;  %v3354_v8 = vcombine.high %v106_v0, %v110_v1  ;;  %v3353_v13 = vcombine.low %v106_v0, %v110_v1  ;;  %v107_v25 = vld [vmem:[#allocation5 + $0x58] sm:$0xff]  ;;  %v174_v0 = vld [vmem:[#allocation5 + $0x270] sm:$0xff] }
  0x82   :  { %965 = vmatprep.subr.bf16.mxu1 %v3416_v28  ;;  %v139_v52 = vld [vmem:[#allocation5 + $0x158] sm:$0xff]  ;;  %v3393_v54 = vcombine.low %v146_v38, %v150_v39 }
  0x84   :  { %925 = vmatpush1.bf16.msra.mxu0 %v3413_v9  ;;  %v114_v9 = vld [vmem:[#allocation5 + $0x90] sm:$0xff] }
  0x85   :  { %926 = vmatprep.subr.bf16.mxu0 %v3422_v11  ;;  %966 = vmatpush1.bf16.msra.mxu1 %v3415_v33  ;;  %v3455_v11 = vcombine.low %v209_v61, %v213_v62  ;;  %v3362_v15 = vcombine.high %v114_v9, %v118_v10  ;;  %v3361_v20 = vcombine.low %v114_v9, %v118_v10  ;;  %v115_v33 = vld [vmem:[#allocation5 + $0x98] sm:$0xff]  ;;  %v182_v9 = vld [vmem:[#allocation5 + $0x2b0] sm:$0xff] }
  0x86   :  { %967 = vmatprep.subr.bf16.mxu1 %v3424_v36  ;;  %v151_v61 = vld [vmem:[#allocation5 + $0x1b8] sm:$0xff] }
  0x88   :  { %927 = vmatpush1.bf16.msra.mxu0 %v3421_v17  ;;  %v103_v17 = vld [vmem:[#allocation5 + $0x38] sm:$0xff] }
  0x89   :  { %928 = vmatprep.subr.bf16.mxu0 %v3430_v19  ;;  %968 = vmatpush1.bf16.msra.mxu1 %v3423_v41  ;;  %v3463_v19 = vcombine.low %v217_v5, %v221_v7  ;;  %v3348_v22 = vcombine.high %v99_v16, %v103_v17  ;;  %v3347_v28 = vcombine.low %v99_v16, %v103_v17  ;;  %v123_v41 = vld [vmem:[#allocation5 + $0xd8] sm:$0xff]  ;;  %v186_v16 = vld [vmem:[#allocation5 + $0x2d0] sm:$0xff] }
  0x8a   :  { %969 = vmatprep.subr.bf16.mxu1 %v3432_v44  ;;  %v155_v5 = vld [vmem:[#allocation5 + $0x1d8] sm:$0xff]  ;;  %v3409_v7 = vcombine.low %v162_v55, %v166_v56  ;;  %v190_v17 = vld [vmem:[#allocation5 + $0x2f0] sm:$0xff] }
  0x8c   :  { %929 = vmatpush1.bf16.msra.mxu0 %v3429_v26  ;;  %v111_v26 = vld [vmem:[#allocation5 + $0x78] sm:$0xff] }
  0x8d   :  { %930 = vmatprep.subr.bf16.mxu0 %v3438_v29  ;;  %970 = vmatpush1.bf16.msra.mxu1 %v3431_v49  ;;  %v3369_v29 = vcombine.low %v122_v14, %v126_v18  ;;  %v3356_v31 = vcombine.high %v107_v25, %v111_v26  ;;  %v3355_v36 = vcombine.low %v107_v25, %v111_v26  ;;  %v158_v49 = vld [vmem:[#allocation5 + $0x1f0] sm:$0xff]  ;;  %v167_v14 = vld [vmem:[#allocation5 + $0x238] sm:$0xff] }
  0x8e   :  { %971 = vmatprep.subr.bf16.mxu1 %v3440_v51  ;;  %v3401_v62 = vcombine.low %v154_v48, %v158_v49  ;;  %v194_v25 = vld [vmem:[#allocation5 + $0x310] sm:$0xff] }
  0x8f   :  { %v198_v26 = vld [vmem:[#allocation5 + $0x330] sm:$0xff] }
  0x90   :  { %931 = vmatpush1.bf16.msra.mxu0 %v3437_v34  ;;  %v119_v34 = vld [vmem:[#allocation5 + $0xb8] sm:$0xff] }
  0x91   :  { %932 = vmatprep.subr.bf16.mxu0 %v3446_v37  ;;  %972 = vmatpush1.bf16.msra.mxu1 %v3439_v57  ;;  %v3377_v37 = vcombine.low %v130_v21, %v134_v27  ;;  %v3364_v40 = vcombine.high %v115_v33, %v119_v34  ;;  %v3363_v44 = vcombine.low %v115_v33, %v119_v34  ;;  %v171_v21 = vld [vmem:[#allocation5 + $0x258] sm:$0xff]  ;;  %v202_v33 = vld [vmem:[#allocation5 + $0x350] sm:$0xff] }
  0x92   :  { %973 = vmatprep.subr.bf16.mxu1 %v3448_v60  ;;  %v147_v60 = vld [vmem:[#allocation5 + $0x198] sm:$0xff]  ;;  %v206_v34 = vld [vmem:[#allocation5 + $0x370] sm:$0xff] }
  0x93   :  { %v3396_v10 = vcombine.high %v147_v60, %v151_v61 }
  0x94   :  { %933 = vmatpush1.bf16.msra.mxu0 %v3445_v42  ;;  %v127_v42 = vld [vmem:[#allocation5 + $0xf8] sm:$0xff] }
  0x95   :  { %934 = vmatprep.subr.bf16.mxu0 %v3454_v45  ;;  %974 = vmatpush1.bf16.msra.mxu1 %v3447_v3  ;;  %v131_v45 = vld [vmem:[#allocation5 + $0x118] sm:$0xff]  ;;  %v3371_v51 = vcombine.low %v123_v41, %v127_v42  ;;  %v3410_v3 = vcombine.high %v162_v55, %v166_v56 }
  0x96   :  { %975 = vmatprep.subr.bf16.mxu1 %v3456_v4  ;;  %v3380_v57 = vcombine.high %v131_v45, %v135_v46  ;;  %v3379_v59 = vcombine.low %v131_v45, %v135_v46  ;;  %v195_v46 = vld [vmem:[#allocation5 + $0x318] sm:$0xff] }
  0x98   :  { %935 = vmatpush1.bf16.msra.mxu0 %v3453_v50  ;;  %v3394_v50 = vcombine.high %v146_v38, %v150_v39  ;;  %v187_v38 = vld [vmem:[#allocation5 + $0x2d8] sm:$0xff] }
  0x99   :  { %936 = vmatprep.subr.bf16.mxu0 %v3462_v53  ;;  %976 = vmatpush1.bf16.msra.mxu1 %v3455_v11  ;;  %v143_v53 = vld [vmem:[#allocation5 + $0x178] sm:$0xff] }
  0x9a   :  { %977 = vmatprep.subr.bf16.mxu1 %v3464_v12  ;;  %v3388_v1 = vcombine.high %v139_v52, %v143_v53  ;;  %v3387_v4 = vcombine.low %v139_v52, %v143_v53  ;;  %v3395_v12 = vcombine.low %v147_v60, %v151_v61  ;;  %v191_v39 = vld [vmem:[#allocation5 + $0x2f8] sm:$0xff] }
  0x9b   :  { %v3435_v52 = vcombine.low %v187_v38, %v191_v39  ;;  %v203_v53 = vld [vmem:[#allocation5 + $0x358] sm:$0xff] }
  0x9c   :  { %937 = vmatpush1.bf16.msra.mxu0 %v3461_v58  ;;  %v3402_v58 = vcombine.high %v154_v48, %v158_v49  ;;  %v3449_v48 = vcombine.low %v202_v33, %v206_v34  ;;  %v218_v49 = vld [vmem:[#allocation5 + $0x3d0] sm:$0xff]  ;;  %v215_v60 = vld [vmem:[#allocation5 + $0x3b8] sm:$0xff] }
  0x9d   :  { %988 = vmatprep.subr.bf16.mxu0 %v3346_v63  ;;  %978 = vmatpush1.bf16.msra.mxu1 %v3463_v19  ;;  %v170_v63 = vld [vmem:[#allocation5 + $0x250] sm:$0xff]  ;;  %v3844_v61 = vld [vmem:[#allocation8 + $0x4] ss:$16 sps:$4 sm:$0xff]  }
  0x9e   :  { %1029 = vmatprep.subr.bf16.mxu1 %v3348_v22  ;;  %v3418_v11 = vcombine.high %v170_v63, %v174_v0  ;;  %v175_v22 = vld [vmem:[#allocation5 + $0x278] sm:$0xff] }
  0x9f   :  { %939 = vmatmul.mubr.bf16.vlgmr.msra.gmra.mrb[0].mxu0 %v4514_v2  ;;  %v3420_v35 = vcombine.high %v171_v21, %v175_v22 }
  0xa0   :  { %989 = vmatpush1.bf16.msra.mxu0 %v3345_v6  ;;  %1020 = vmatprep.mubr.bf16.mxu0 %v4510_v23  ;;  %v159_v6 = vld [vmem:[#allocation5 + $0x1f8] sm:$0xff] }
  0xa1   :  { %990 = vmatprep.subr.bf16.mxu0 %v3354_v8  ;;  %980 = vmatmul.mubr.bf16.vlgmr.msra.gmra.mrb[0].mxu1 %v4514_v2  ;;  %v178_v8 = vld [vmem:[#allocation5 + $0x290] sm:$0xff]  ;;  %v3404_v18 = vcombine.high %v155_v5, %v159_v6 }
  0xa2   :  { %1030 = vmatpush1.bf16.msra.mxu1 %v3347_v28  ;;  %1061 = vmatprep.mubr.bf16.mxu1 %v4510_v23  ;;  %v3372_v23 = vcombine.high %v123_v41, %v127_v42  ;;  %v3426_v19 = vcombine.high %v178_v8, %v182_v9  ;;  %v3434_v28 = vcombine.high %v186_v16, %v190_v17  ;;  %v210_v41 = vld [vmem:[#allocation5 + $0x390] sm:$0xff] }
  0xa3   :  { %1031 = vmatprep.subr.bf16.mxu1 %v3356_v31  ;;  %v183_v31 = vld [vmem:[#allocation5 + $0x2b8] sm:$0xff]  ;;  %v214_v42 = vld [vmem:[#allocation5 + $0x3b0] sm:$0xff] }
  0xa4   :  { %991 = vmatpush1.bf16.msra.mxu0 %v3353_v13  ;;  %v163_v13 = vld [vmem:[#allocation5 + $0x218] sm:$0xff]  ;;  %v3427_v45 = vcombine.low %v179_v30, %v183_v31  ;;  %v3457_v55 = vcombine.low %v210_v41, %v214_v42 }
  0xa5   :  { %992 = vmatprep.subr.bf16.mxu0 %v3362_v15  ;;  %v3417_v15 = vcombine.low %v170_v63, %v174_v0  ;;  %v3412_v27 = vcombine.high %v163_v13, %v167_v14  ;;  %v3842_v0 = vld [vmem:[#allocation8] ss:$16 sps:$4 sm:$0xff]  }
  0xa6   :  { %1032 = vmatpush1.bf16.msra.mxu1 %v3355_v36  ;;  %v3442_v36 = vcombine.high %v194_v25, %v198_v26 }
  0xa7   :  { %1033 = vmatprep.subr.bf16.mxu1 %v3364_v40  ;;  %v3441_v40 = vcombine.low %v194_v25, %v198_v26  ;;  %v3865_v25 = vld [vmem:[#allocation8 + $0x6c] ss:$16 sps:$4 sm:$0xff]   ;;  %v3872_v26 = vld [vmem:[#allocation8 + $0xa0] ss:$16 sps:$4 sm:$0xff]  }
  0xa8   :  { %993 = vmatpush1.bf16.msra.mxu0 %v3361_v20  ;;  %v3403_v20 = vcombine.low %v155_v5, %v159_v6  ;;  %v3850_v5 = vld [vmem:[#allocation8 + $0x24] ss:$16 sps:$4 sm:$0xff]  }
  0xa9   :  { %994 = vmatprep.subr.bf16.mxu0 %v3370_v24  ;;  %v3425_v24 = vcombine.low %v178_v8, %v182_v9  ;;  %v3856_v9 = vld [vmem:[#allocation8 + $0x44] ss:$16 sps:$4 sm:$0xff]  }
  0xaa   :  { %1034 = vmatpush1.bf16.msra.mxu1 %v3363_v44  ;;  %v3450_v44 = vcombine.high %v202_v33, %v206_v34  ;;  %v3884_v33 = vld [vmem:[#allocation8 + $0xe0] ss:$16 sps:$4 sm:$0xff]   ;;  %v3875_v34 = vld [vmem:[#allocation8 + $0xa8] ss:$16 sps:$4 sm:$0xff]  }
  0xab   :  { %1035 = vmatprep.subr.bf16.mxu1 %v3372_v23  ;;  %v222_v23 = vld [vmem:[#allocation5 + $0x3f0] sm:$0xff] }
  0xac   :  { %995 = vmatpush1.bf16.msra.mxu0 %v3369_v29  ;;  %v3411_v29 = vcombine.low %v163_v13, %v167_v14  ;;  %v3862_v14 = vld [vmem:[#allocation8 + $0x64] ss:$16 sps:$4 sm:$0xff]  }
  0xad   :  { %996 = vmatprep.subr.bf16.mxu0 %v3378_v32  ;;  %v3433_v32 = vcombine.low %v186_v16, %v190_v17  ;;  %v3853_v16 = vld [vmem:[#allocation8 + $0x2c] ss:$16 sps:$4 sm:$0xff]   ;;  %v3860_v17 = vld [vmem:[#allocation8 + $0x60] ss:$16 sps:$4 sm:$0xff]  }
  0xae   :  { %1036 = vmatpush1.bf16.msra.mxu1 %v3371_v51  ;;  %v3458_v51 = vcombine.high %v210_v41, %v214_v42  ;;  %v3896_v41 = vld [vmem:[#allocation8 + $0x120] ss:$16 sps:$4 sm:$0xff]   ;;  %v3887_v42 = vld [vmem:[#allocation8 + $0xe8] ss:$16 sps:$4 sm:$0xff]  }
  0xaf   :  { %1037 = vmatprep.subr.bf16.mxu1 %v3380_v57  ;;  %v3466_v57 = vcombine.high %v218_v49, %v222_v23 }
  0xb0   :  { %997 = vmatpush1.bf16.msra.mxu0 %v3377_v37  ;;  %v3419_v37 = vcombine.low %v171_v21, %v175_v22  ;;  %v3866_v21 = vld [vmem:[#allocation8 + $0x80] ss:$16 sps:$4 sm:$0xff]   ;;  %v3874_v22 = vld [vmem:[#allocation8 + $0xa4] ss:$16 sps:$4 sm:$0xff]  }
  0xb1   :  { %998 = vmatprep.subr.bf16.mxu0 %v3386_v43  ;;  %v3428_v43 = vcombine.high %v179_v30, %v183_v31  ;;  %v3869_v30 = vld [vmem:[#allocation8 + $0x88] ss:$16 sps:$4 sm:$0xff]   ;;  %v3886_v31 = vld [vmem:[#allocation8 + $0xe4] ss:$16 sps:$4 sm:$0xff]  }
  0xb2   :  { %1038 = vmatpush1.bf16.msra.mxu1 %v3379_v59  ;;  %v211_v59 = vld [vmem:[#allocation5 + $0x398] sm:$0xff] }
  0xb3   :  { %1039 = vmatprep.subr.bf16.mxu1 %v3388_v1  ;;  %v3460_v6 = vcombine.high %v211_v59, %v215_v60  ;;  %v3459_v8 = vcombine.low %v211_v59, %v215_v60  ;;  %v3919_v59 = vld [vmem:[#allocation8 + $0x18c] ss:$16 sps:$4 sm:$0xff]   ;;  %v3926_v60 = vld [vmem:[#allocation8 + $0x1c0] ss:$16 sps:$4 sm:$0xff]  }
  0xb4   :  { %999 = vmatpush1.bf16.msra.mxu0 %v3385_v47  ;;  %v199_v47 = vld [vmem:[#allocation5 + $0x338] sm:$0xff] }
  0xb5   :  { %1000 = vmatprep.subr.bf16.mxu0 %v3394_v50  ;;  %v3436_v50 = vcombine.high %v187_v38, %v191_v39  ;;  %v3444_v56 = vcombine.high %v195_v46, %v199_v47  ;;  %v3881_v38 = vld [vmem:[#allocation8 + $0xc8] ss:$16 sps:$4 sm:$0xff]   ;;  %v3898_v39 = vld [vmem:[#allocation8 + $0x124] ss:$16 sps:$4 sm:$0xff]  }
  0xb6   :  { %1040 = vmatpush1.bf16.msra.mxu1 %v3387_v4  ;;  %v223_v4 = vld [vmem:[#allocation5 + $0x3f8] sm:$0xff] }
  0xb7   :  { %1041 = vmatprep.subr.bf16.mxu1 %v3396_v10 }
  0xb8   :  { %1001 = vmatpush1.bf16.msra.mxu0 %v3393_v54  ;;  %v207_v54 = vld [vmem:[#allocation5 + $0x378] sm:$0xff] }
  0xb9   :  { %1002 = vmatprep.subr.bf16.mxu0 %v3402_v58  ;;  %v3443_v58 = vcombine.low %v195_v46, %v199_v47  ;;  %v3452_v63 = vcombine.high %v203_v53, %v207_v54  ;;  %v3451_v1 = vcombine.low %v203_v53, %v207_v54  ;;  %v3893_v46 = vld [vmem:[#allocation8 + $0x108] ss:$16 sps:$4 sm:$0xff]   ;;  %v3910_v47 = vld [vmem:[#allocation8 + $0x164] ss:$16 sps:$4 sm:$0xff]  }
  0xba   :  { %1042 = vmatpush1.bf16.msra.mxu1 %v3395_v12  ;;  %v3854_v12 = vld [vmem:[#allocation8 + $0x40] ss:$16 sps:$4 sm:$0xff]   ;;  %v3905_v53 = vld [vmem:[#allocation8 + $0x148] ss:$16 sps:$4 sm:$0xff]   ;;  %v3922_v54 = vld [vmem:[#allocation8 + $0x1a4] ss:$16 sps:$4 sm:$0xff]  }
  0xbb   :  { %1043 = vmatprep.subr.bf16.mxu1 %v3404_v18  ;;  %v3868_v18 = vld [vmem:[#allocation8 + $0x84] ss:$16 sps:$4 sm:$0xff]  }
  0xbc   :  { %1003 = vmatpush1.bf16.msra.mxu0 %v3401_v62  ;;  %v3465_v62 = vcombine.low %v218_v49, %v222_v23  ;;  %v3908_v49 = vld [vmem:[#allocation8 + $0x160] ss:$16 sps:$4 sm:$0xff]   ;;  %v3899_v23 = vld [vmem:[#allocation8 + $0x128] ss:$16 sps:$4 sm:$0xff]  }
  0xbd   :  { %1004 = vmatprep.subr.bf16.mxu0 %v3410_v3  ;;  %v219_v3 = vld [vmem:[#allocation5 + $0x3d8] sm:$0xff] }
  0xbe   :  { %1044 = vmatpush1.bf16.msra.mxu1 %v3403_v20  ;;  %v3468_v10 = vcombine.high %v219_v3, %v223_v4  ;;  %v3467_v13 = vcombine.low %v219_v3, %v223_v4  ;;  %v3859_v20 = vld [vmem:[#allocation8 + $0x4c] ss:$16 sps:$4 sm:$0xff]   ;;  %v3923_v3 = vld [vmem:[#allocation8 + $0x1a8] ss:$16 sps:$4 sm:$0xff]  }
  0xbf   :  { %1045 = vmatprep.subr.bf16.mxu1 %v3412_v27  ;;  %v3863_v27 = vld [vmem:[#allocation8 + $0x68] ss:$16 sps:$4 sm:$0xff]   ;;  %v3931_v4 = vld [vmem:[#allocation8 + $0x1cc] ss:$16 sps:$4 sm:$0xff]  }
  0xc0   :  { %1005 = vmatpush1.bf16.msra.mxu0 %v3409_v7  ;;  %v3848_v7 = vld [vmem:[#allocation8 + $0x20] ss:$16 sps:$4 sm:$0xff]  }
  0xc1   :  { %1006 = vmatprep.subr.bf16.mxu0 %v3418_v11  ;;  %v3847_v11 = vld [vmem:[#allocation8 + $0xc] ss:$16 sps:$4 sm:$0xff]  }
  0xc2   :  { %1046 = vmatpush1.bf16.msra.mxu1 %v3411_v29  ;;  %v3871_v29 = vld [vmem:[#allocation8 + $0x8c] ss:$16 sps:$4 sm:$0xff]  }
  0xc3   :  { %1047 = vmatprep.subr.bf16.mxu1 %v3420_v35  ;;  %v3892_v35 = vld [vmem:[#allocation8 + $0x104] ss:$16 sps:$4 sm:$0xff]  }
  0xc4   :  { %1007 = vmatpush1.bf16.msra.mxu0 %v3417_v15  ;;  %v3845_v15 = vld [vmem:[#allocation8 + $0x8] ss:$16 sps:$4 sm:$0xff]  }
  0xc5   :  { %1008 = vmatprep.subr.bf16.mxu0 %v3426_v19  ;;  %v3851_v19 = vld [vmem:[#allocation8 + $0x28] ss:$16 sps:$4 sm:$0xff]  }
  0xc6   :  { %1048 = vmatpush1.bf16.msra.mxu1 %v3419_v37  ;;  %v3890_v37 = vld [vmem:[#allocation8 + $0x100] ss:$16 sps:$4 sm:$0xff]  }
  0xc7   :  { %1049 = vmatprep.subr.bf16.mxu1 %v3428_v43  ;;  %v3904_v43 = vld [vmem:[#allocation8 + $0x144] ss:$16 sps:$4 sm:$0xff]  }
  0xc8   :  { %1009 = vmatpush1.bf16.msra.mxu0 %v3425_v24  ;;  %v3857_v24 = vld [vmem:[#allocation8 + $0x48] ss:$16 sps:$4 sm:$0xff]  }
  0xc9   :  { %1010 = vmatprep.subr.bf16.mxu0 %v3434_v28  ;;  %v3880_v28 = vld [vmem:[#allocation8 + $0xc4] ss:$16 sps:$4 sm:$0xff]  }
  0xca   :  { %1050 = vmatpush1.bf16.msra.mxu1 %v3427_v45  ;;  %v3902_v45 = vld [vmem:[#allocation8 + $0x140] ss:$16 sps:$4 sm:$0xff]  }
  0xcb   :  { %1051 = vmatprep.subr.bf16.mxu1 %v3436_v50  ;;  %v3916_v50 = vld [vmem:[#allocation8 + $0x184] ss:$16 sps:$4 sm:$0xff]  }
  0xcc   :  { %1011 = vmatpush1.bf16.msra.mxu0 %v3433_v32  ;;  %v3877_v32 = vld [vmem:[#allocation8 + $0xac] ss:$16 sps:$4 sm:$0xff]  }
  0xcd   :  { %1012 = vmatprep.subr.bf16.mxu0 %v3442_v36  ;;  %v3883_v36 = vld [vmem:[#allocation8 + $0xcc] ss:$16 sps:$4 sm:$0xff]  }
  0xce   :  { %1052 = vmatpush1.bf16.msra.mxu1 %v3435_v52  ;;  %v3914_v52 = vld [vmem:[#allocation8 + $0x180] ss:$16 sps:$4 sm:$0xff]  }
  0xcf   :  { %1053 = vmatprep.subr.bf16.mxu1 %v3444_v56  ;;  %v3920_v56 = vld [vmem:[#allocation8 + $0x1a0] ss:$16 sps:$4 sm:$0xff]  }
  0xd0   :  { %1013 = vmatpush1.bf16.msra.mxu0 %v3441_v40  ;;  %v3889_v40 = vld [vmem:[#allocation8 + $0xec] ss:$16 sps:$4 sm:$0xff]  }
  0xd1   :  { %1014 = vmatprep.subr.bf16.mxu0 %v3450_v44  ;;  %v3895_v44 = vld [vmem:[#allocation8 + $0x10c] ss:$16 sps:$4 sm:$0xff]  }
  0xd2   :  { %1054 = vmatpush1.bf16.msra.mxu1 %v3443_v58  ;;  %v3911_v58 = vld [vmem:[#allocation8 + $0x168] ss:$16 sps:$4 sm:$0xff]  }
  0xd3   :  { %1055 = vmatprep.subr.bf16.mxu1 %v3452_v63  ;;  %v3925_v63 = vld [vmem:[#allocation8 + $0x1ac] ss:$16 sps:$4 sm:$0xff]  }
  0xd4   :  { %1015 = vmatpush1.bf16.msra.mxu0 %v3449_v48  ;;  %v3901_v48 = vld [vmem:[#allocation8 + $0x12c] ss:$16 sps:$4 sm:$0xff]  }
  0xd5   :  { %1016 = vmatprep.subr.bf16.mxu0 %v3458_v51  ;;  %v3907_v51 = vld [vmem:[#allocation8 + $0x14c] ss:$16 sps:$4 sm:$0xff]  }
  0xd6   :  { %1056 = vmatpush1.bf16.msra.mxu1 %v3451_v1  ;;  %v3940_v1 = vld [vmem:[#allocation8 + $0x204] ss:$16 sps:$4 sm:$0xff]  }
  0xd7   :  { %1057 = vmatprep.subr.bf16.mxu1 %v3460_v6  ;;  %v3937_v6 = vld [vmem:[#allocation8 + $0x1ec] ss:$16 sps:$4 sm:$0xff]  }
  0xd8   :  { %1017 = vmatpush1.bf16.msra.mxu0 %v3457_v55  ;;  %v3913_v55 = vld [vmem:[#allocation8 + $0x16c] ss:$16 sps:$4 sm:$0xff]  }
  0xd9   :  { %1018 = vmatprep.subr.bf16.mxu0 %v3466_v57  ;;  %v3928_v57 = vld [vmem:[#allocation8 + $0x1c4] ss:$16 sps:$4 sm:$0xff]  }
  0xda   :  { %1058 = vmatpush1.bf16.msra.mxu1 %v3459_v8  ;;  %v3943_v8 = vld [vmem:[#allocation8 + $0x20c] ss:$16 sps:$4 sm:$0xff]  }
  0xdb   :  { %1059 = vmatprep.subr.bf16.mxu1 %v3468_v10 }
  0xdc   :  { %1019 = vmatpush1.bf16.msra.mxu0 %v3465_v62  ;;  %v3917_v62 = vld [vmem:[#allocation8 + $0x188] ss:$16 sps:$4 sm:$0xff]  }
  0xdd   :  { %2644 = vmatprep.subr.bf16.mxu0 %v3844_v61  ;;  %v3934_v61 = vld [vmem:[#allocation8 + $0x1e4] ss:$16 sps:$4 sm:$0xff]  }
  0xde   :  { %1060 = vmatpush1.bf16.msra.mxu1 %v3467_v13 }
  0xdf   :  { %1021 = vmatmul.mubr.bf16.vlgmr.msra.gmra.mrb[4].mxu0 %v4514_v2  ;;  %2808 = vmatprep.subr.bf16.mxu1 %v3847_v11 }
  0xe0   :  { %2645 = vmatpush1.bf16.msra.mxu0 %v3842_v0  ;;  %v3932_v0 = vld [vmem:[#allocation8 + $0x1e0] ss:$16 sps:$4 sm:$0xff]  }
  0xe1   :  { %2646 = vmatprep.subr.bf16.mxu0 %v3850_v5  ;;  %1062 = vmatmul.mubr.bf16.vlgmr.msra.gmra.mrb[4].mxu1 %v4514_v2  ;;  %v3878_v2 = vld [vmem:[#allocation8 + $0xc0] ss:$16 sps:$4 sm:$0xff]   ;;  %v3929_v5 = vld [vmem:[#allocation8 + $0x1c8] ss:$16 sps:$4 sm:$0xff]  }
  0xe2   :  { %2809 = vmatpush1.bf16.msra.mxu1 %v3845_v15 }
  0xe3   :  { %2810 = vmatprep.subr.bf16.mxu1 %v3853_v16 }
  0xe4   :  { %2647 = vmatpush1.bf16.msra.mxu0 %v3848_v7  ;;  %v3935_v7 = vld [vmem:[#allocation8 + $0x1e8] ss:$16 sps:$4 sm:$0xff]  }
  0xe5   :  { %2648 = vmatprep.subr.bf16.mxu0 %v3856_v9  ;;  %v226_v9 = vlaneseq }
  0xe6   :  { %2811 = vmatpush1.bf16.msra.mxu1 %v3851_v19 }
  0xe7   :  { %2812 = vmatprep.subr.bf16.mxu1 %v3859_v20  ;;  %v4522_v10 = vshrl.u32 %v226_v9, 7  ;;  %v4000_v9 = vld [vmem:[#allocation8 + $0x344] ss:$16 sps:$4 sm:$0xff]  }
  0xe8   :  { %2649 = vmatpush1.bf16.msra.mxu0 %v3854_v12  ;;  %v4525_v12 = vld [vmem:[#allocation7] sm:$0xff] }
  0xe9   :  { %2650 = vmatprep.subr.bf16.mxu0 %v3862_v14  ;;  %v228_v11 = vsub.s32 0, %v4522_v10  ;;  %v232_v13 = vsub.s32 1, %v4522_v10 }
  0xea   :  { %2813 = vmatpush1.bf16.msra.mxu1 %v3857_v24 }
  0xeb   :  { %2814 = vmatprep.subr.bf16.mxu1 %v3865_v25  ;;  %v229_v14 = vrot.slane %v4525_v12, %v228_v11  ;;  %v233_v15 = vrot.slane %v4525_v12, %v232_v13  ;;  %v240_v25 = vsub.s32 3, %v4522_v10 }
  0xec   :  { %2651 = vmatpush1.bf16.msra.mxu0 %v3860_v17 }
  0xed   :  { %2652 = vmatprep.subr.bf16.mxu0 %v3868_v18 }
  0xee   :  { %2815 = vmatpush1.bf16.msra.mxu1 %v3863_v27  ;;  %v3938_v27 = vld [vmem:[#allocation8 + $0x200] ss:$16 sps:$4 sm:$0xff]  }
  0xef   :  { %2816 = vmatprep.subr.bf16.mxu1 %v3871_v29 }
  0xf0   :  { %2653 = vmatpush1.bf16.msra.mxu0 %v3866_v21 }
  0xf1   :  { %2654 = vmatprep.subr.bf16.mxu0 %v3874_v22 }
  0xf2   :  { %2817 = vmatpush1.bf16.msra.mxu1 %v3869_v30  ;;  %v3949_v30 = vld [vmem:[#allocation8 + $0x22c] ss:$16 sps:$4 sm:$0xff]  }
  0xf3   :  { %2818 = vmatprep.subr.bf16.mxu1 %v3877_v32  ;;  %v3944_v32 = vld [vmem:[#allocation8 + $0x220] ss:$16 sps:$4 sm:$0xff]  }
  0xf4   :  { %2655 = vmatpush1.bf16.msra.mxu0 %v3872_v26 }
  0xf5   :  { %2656 = vmatprep.subr.bf16.mxu0 %v3880_v28  ;;  %v3941_v28 = vld [vmem:[#allocation8 + $0x208] ss:$16 sps:$4 sm:$0xff]  }
  0xf6   :  { %2819 = vmatpush1.bf16.msra.mxu1 %v3875_v34  ;;  %v3952_v34 = vld [vmem:[#allocation8 + $0x244] ss:$16 sps:$4 sm:$0xff]  }
  0xf7   :  { %2820 = vmatprep.subr.bf16.mxu1 %v3883_v36 }
  0xf8   :  { %2657 = vmatpush1.bf16.msra.mxu0 %v3878_v2  ;;  %v3946_v2 = vld [vmem:[#allocation8 + $0x224] ss:$16 sps:$4 sm:$0xff]  }
  0xf9   :  { %2658 = vmatprep.subr.bf16.mxu0 %v3886_v31  ;;  %v241_v31 = vrot.slane %v4525_v12, %v240_v25 }
  0xfa   :  { %2821 = vmatpush1.bf16.msra.mxu1 %v3881_v38 }
  0xfb   :  { %2822 = vmatprep.subr.bf16.mxu1 %v3889_v40  ;;  %v3950_v40 = vld [vmem:[#allocation8 + $0x240] ss:$16 sps:$4 sm:$0xff]  }
  0xfc   :  { %2659 = vmatpush1.bf16.msra.mxu0 %v3884_v33  ;;  %v3947_v33 = vld [vmem:[#allocation8 + $0x228] ss:$16 sps:$4 sm:$0xff]  }
  0xfd   :  { %2660 = vmatprep.subr.bf16.mxu0 %v3892_v35  ;;  %v3955_v35 = vld [vmem:[#allocation8 + $0x24c] ss:$16 sps:$4 sm:$0xff]  }
  0xfe   :  { %2823 = vmatpush1.bf16.msra.mxu1 %v3887_v42 }
  0xff   :  { %2824 = vmatprep.subr.bf16.mxu1 %v3895_v44  ;;  %v3961_v44 = vld [vmem:[#allocation8 + $0x26c] ss:$16 sps:$4 sm:$0xff]  }
 0x100   :  { %2661 = vmatpush1.bf16.msra.mxu0 %v3890_v37 }
 0x101   :  { %2662 = vmatprep.subr.bf16.mxu0 %v3898_v39 }
 0x102   :  { %2825 = vmatpush1.bf16.msra.mxu1 %v3893_v46 }
 0x103   :  { %2826 = vmatprep.subr.bf16.mxu1 %v3901_v48  ;;  %v3959_v48 = vld [vmem:[#allocation8 + $0x268] ss:$16 sps:$4 sm:$0xff]  }
 0x104   :  { %2663 = vmatpush1.bf16.msra.mxu0 %v3896_v41  ;;  %v3953_v41 = vld [vmem:[#allocation8 + $0x248] ss:$16 sps:$4 sm:$0xff]  }
 0x105   :  { %2664 = vmatprep.subr.bf16.mxu0 %v3904_v43  ;;  %v3958_v43 = vld [vmem:[#allocation8 + $0x264] ss:$16 sps:$4 sm:$0xff]  }
 0x106   :  { %2827 = vmatpush1.bf16.msra.mxu1 %v3899_v23  ;;  %v3967_v23 = vld [vmem:[#allocation8 + $0x28c] ss:$16 sps:$4 sm:$0xff]  }
 0x107   :  { %2828 = vmatprep.subr.bf16.mxu1 %v3907_v51  ;;  %v3965_v51 = vld [vmem:[#allocation8 + $0x288] ss:$16 sps:$4 sm:$0xff]  }
 0x108   :  { %2665 = vmatpush1.bf16.msra.mxu0 %v3902_v45 }
 0x109   :  { %2666 = vmatprep.subr.bf16.mxu0 %v3910_v47  ;;  %v3956_v47 = vld [vmem:[#allocation8 + $0x260] ss:$16 sps:$4 sm:$0xff]  }
 0x10a   :  { %2829 = vmatpush1.bf16.msra.mxu1 %v3905_v53  ;;  %v3973_v53 = vld [vmem:[#allocation8 + $0x2ac] ss:$16 sps:$4 sm:$0xff]  }
 0x10b   :  { %2830 = vmatprep.subr.bf16.mxu1 %v3913_v55  ;;  %v3971_v55 = vld [vmem:[#allocation8 + $0x2a8] ss:$16 sps:$4 sm:$0xff]  }
 0x10c   :  { %2667 = vmatpush1.bf16.msra.mxu0 %v3908_v49  ;;  %v3964_v49 = vld [vmem:[#allocation8 + $0x284] ss:$16 sps:$4 sm:$0xff]  }
 0x10d   :  { %2668 = vmatprep.subr.bf16.mxu0 %v3916_v50  ;;  %v3962_v50 = vld [vmem:[#allocation8 + $0x280] ss:$16 sps:$4 sm:$0xff]  }
 0x10e   :  { %2831 = vmatpush1.bf16.msra.mxu1 %v3911_v58  ;;  %v3974_v58 = vld [vmem:[#allocation8 + $0x2c0] ss:$16 sps:$4 sm:$0xff]  }
 0x10f   :  { %2832 = vmatprep.subr.bf16.mxu1 %v3919_v59  ;;  %v3977_v59 = vld [vmem:[#allocation8 + $0x2c8] ss:$16 sps:$4 sm:$0xff]  }
 0x110   :  { %2669 = vmatpush1.bf16.msra.mxu0 %v3914_v52  ;;  %v3970_v52 = vld [vmem:[#allocation8 + $0x2a4] ss:$16 sps:$4 sm:$0xff]  }
 0x111   :  { %2670 = vmatprep.subr.bf16.mxu0 %v3922_v54  ;;  %v3968_v54 = vld [vmem:[#allocation8 + $0x2a0] ss:$16 sps:$4 sm:$0xff]  }
 0x112   :  { %2833 = vmatpush1.bf16.msra.mxu1 %v3917_v62  ;;  %v3980_v62 = vld [vmem:[#allocation8 + $0x2e0] ss:$16 sps:$4 sm:$0xff]  }
 0x113   :  { %2834 = vmatprep.subr.bf16.mxu1 %v3925_v63  ;;  %v3983_v63 = vld [vmem:[#allocation8 + $0x2e8] ss:$16 sps:$4 sm:$0xff]  }
 0x114   :  { %2671 = vmatpush1.bf16.msra.mxu0 %v3920_v56  ;;  %v3976_v56 = vld [vmem:[#allocation8 + $0x2c4] ss:$16 sps:$4 sm:$0xff]  }
 0x115   :  { %2672 = vmatprep.subr.bf16.mxu0 %v3928_v57  ;;  %v3979_v57 = vld [vmem:[#allocation8 + $0x2cc] ss:$16 sps:$4 sm:$0xff]  }
 0x116   :  { %2835 = vmatpush1.bf16.msra.mxu1 %v3923_v3  ;;  %v3986_v3 = vld [vmem:[#allocation8 + $0x300] ss:$16 sps:$4 sm:$0xff]  }
 0x117   :  { %2836 = vmatprep.subr.bf16.mxu1 %v3931_v4  ;;  %v3989_v4 = vld [vmem:[#allocation8 + $0x308] ss:$16 sps:$4 sm:$0xff]  }
 0x118   :  { %2673 = vmatpush1.bf16.msra.mxu0 %v3926_v60  ;;  %v3982_v60 = vld [vmem:[#allocation8 + $0x2e4] ss:$16 sps:$4 sm:$0xff]  }
 0x119   :  { %2674 = vmatprep.subr.bf16.mxu0 %v3934_v61  ;;  %v3985_v61 = vld [vmem:[#allocation8 + $0x2ec] ss:$16 sps:$4 sm:$0xff]  }
 0x11a   :  { %2837 = vmatpush1.bf16.msra.mxu1 %v3929_v5  ;;  %v3994_v5 = vld [vmem:[#allocation8 + $0x324] ss:$16 sps:$4 sm:$0xff]  }
 0x11b   :  { %2838 = vmatprep.subr.bf16.mxu1 %v3937_v6  ;;  %v3997_v6 = vld [vmem:[#allocation8 + $0x32c] ss:$16 sps:$4 sm:$0xff]  }
 0x11c   :  { %2675 = vmatpush1.bf16.msra.mxu0 %v3932_v0  ;;  %v3988_v0 = vld [vmem:[#allocation8 + $0x304] ss:$16 sps:$4 sm:$0xff]  }
 0x11d   :  { %2685 = vmatprep.subr.bf16.mxu0 %v3940_v1  ;;  %v3991_v1 = vld [vmem:[#allocation8 + $0x30c] ss:$16 sps:$4 sm:$0xff]  }
 0x11e   :  { %2839 = vmatpush1.bf16.msra.mxu1 %v3935_v7  ;;  %v3992_v7 = vld [vmem:[#allocation8 + $0x320] ss:$16 sps:$4 sm:$0xff]  }
 0x11f   :  { %2849 = vmatprep.subr.bf16.mxu1 %v3943_v8  ;;  %v3995_v8 = vld [vmem:[#allocation8 + $0x328] ss:$16 sps:$4 sm:$0xff]  }
 0x172   :  { %v940_v16 = vpop.f32.mrb[0].mxu0 }
 0x173   :  { %v941_v17 = vadd.f32 %v940_v16, %v229_v14  ;;  %v942_v18 = vpop.f32.mrb[1].mxu0  ;;  %v4003_v14 = vld [vmem:[#allocation8 + $0x34c] ss:$16 sps:$4 sm:$0xff]   ;;  %v4001_v16 = vld [vmem:[#allocation8 + $0x348] ss:$16 sps:$4 sm:$0xff]  }
 0x174   :  { %v943_v19 = vadd.f32 %v942_v18, %v233_v15  ;;  %v944_v20 = vpop.f32.mrb[2].mxu0  ;;  %v4538_v36 = vpop.f32.mrb[0].mxu1  ;;  %v3998_v15 = vld [vmem:[#allocation8 + $0x340] ss:$16 sps:$4 sm:$0xff]   ;;  %v4009_v18 = vld [vmem:[#allocation8 + $0x36c] ss:$16 sps:$4 sm:$0xff]  }
 0x175   :  { %v1070_v21 = vmax.f32 %v941_v17, 0.0  ;;  %v945_v22 = vpop.f32.mrb[3].mxu0  ;;  %v983_v37 = vpop.f32.mrb[1].mxu1  ;;  %v4006_v17 = vld [vmem:[#allocation8 + $0x364] ss:$16 sps:$4 sm:$0xff]  }
 0x176   :  { %v1071_v24 = vmax.f32 %v943_v19, 0.0  ;;  %v984_v38 = vadd.f32 %v983_v37, %v241_v31  ;;  %v985_v39 = vpop.f32.mrb[2].mxu1  ;;  %v4004_v19 = vld [vmem:[#allocation8 + $0x360] ss:$16 sps:$4 sm:$0xff]   ;;  %v4007_v20 = vld [vmem:[#allocation8 + $0x368] ss:$16 sps:$4 sm:$0xff]  }
 0x177   :  { %v1078_v29 = vpack.c.bf16 %v1070_v21, %v1070_v21  ;;  %v986_v42 = vpop.f32.mrb[3].mxu1  ;;  %v4012_v21 = vld [vmem:[#allocation8 + $0x384] ss:$16 sps:$4 sm:$0xff]   ;;  %v4015_v22 = vld [vmem:[#allocation8 + $0x38c] ss:$16 sps:$4 sm:$0xff]  }
 0x178   :  { %v1079_v26 = vpack.c.bf16 %v1071_v24, %v1071_v24  ;;  %v1073_v45 = vmax.f32 %v984_v38, 0.0  ;;  %v236_v24 = vsub.s32 2, %v4522_v10  ;;  %v4019_v31 = vld [vmem:[#allocation8 + $0x3a8] ss:$16 sps:$4 sm:$0xff]   ;;  %v4022_v37 = vld [vmem:[#allocation8 + $0x3c0] ss:$16 sps:$4 sm:$0xff]  }
 0x179   :  { %v4025_v38 = vld [vmem:[#allocation8 + $0x3c8] ss:$16 sps:$4 sm:$0xff]  }
 0x17a   :  { %2676 = vmatprep.mubr.bf16.mxu0 %v1079_v26  ;;  %2840 = vmatprep.mubr.bf16.mxu1 %v1079_v26  ;;  %v1081_v46 = vpack.c.bf16 %v1073_v45, %v1073_v45  ;;  %v4010_v26 = vld [vmem:[#allocation8 + $0x380] ss:$16 sps:$4 sm:$0xff]  }
 0x17b   :  { %2677 = vmatmul.mubr.bf16.vlgmr.msra.gmra.mrb[8].mxu0 %v1078_v29  ;;  %2841 = vmatmul.mubr.bf16.vlgmr.msra.gmra.mrb[8].mxu1 %v1078_v29  ;;  %v4021_v29 = vld [vmem:[#allocation8 + $0x3ac] ss:$16 sps:$4 sm:$0xff]   ;;  %v4028_v45 = vld [vmem:[#allocation8 + $0x3e0] ss:$16 sps:$4 sm:$0xff]  }
 0x17c   :  { %2686 = vmatpush1.bf16.msra.mxu0 %v3938_v27  ;;  %2850 = vmatpush1.bf16.msra.mxu1 %v3941_v28  ;;  %v4013_v27 = vld [vmem:[#allocation8 + $0x388] ss:$16 sps:$4 sm:$0xff]   ;;  %v4018_v28 = vld [vmem:[#allocation8 + $0x3a4] ss:$16 sps:$4 sm:$0xff]  }
 0x17d   :  { %2687 = vmatprep.subr.bf16.mxu0 %v3946_v2  ;;  %2851 = vmatprep.subr.bf16.mxu1 %v3949_v30  ;;  %v237_v2 = vrot.slane %v4525_v12, %v236_v24  ;;  %v4016_v30 = vld [vmem:[#allocation8 + $0x3a0] ss:$16 sps:$4 sm:$0xff]  }
 0x17e   :  { %2717 = vmatprep.mubr.bf16.mxu0 %v1081_v46  ;;  %2881 = vmatprep.mubr.bf16.mxu1 %v1081_v46  ;;  %v4031_v46 = vld [vmem:[#allocation8 + $0x3e8] ss:$16 sps:$4 sm:$0xff]  }
 0x180   :  { %2688 = vmatpush1.bf16.msra.mxu0 %v3944_v32  ;;  %2852 = vmatpush1.bf16.msra.mxu1 %v3947_v33  ;;  %v248_v32 = vsub.s32 5, %v4522_v10  ;;  %v4024_v33 = vld [vmem:[#allocation8 + $0x3c4] ss:$16 sps:$4 sm:$0xff]  }
 0x181   :  { %2689 = vmatprep.subr.bf16.mxu0 %v3952_v34  ;;  %2853 = vmatprep.subr.bf16.mxu1 %v3955_v35  ;;  %v4027_v34 = vld [vmem:[#allocation8 + $0x3cc] ss:$16 sps:$4 sm:$0xff]   ;;  %v982_v35 = vadd.f32 %v4538_v36, %v237_v2  ;;  %v4079_v2 = vld [vmem:[#allocation8 + $0x4e8] ss:$16 sps:$4 sm:$0xff]  }
 0x182   :  { %v249_v39 = vrot.slane %v4525_v12, %v248_v32  ;;  %v4082_v32 = vld [vmem:[#allocation8 + $0x500] ss:$16 sps:$4 sm:$0xff]  }
 0x184   :  { %2690 = vmatpush1.bf16.msra.mxu0 %v3950_v40  ;;  %2854 = vmatpush1.bf16.msra.mxu1 %v3953_v41  ;;  %v4030_v40 = vld [vmem:[#allocation8 + $0x3e4] ss:$16 sps:$4 sm:$0xff]   ;;  %v4033_v41 = vld [vmem:[#allocation8 + $0x3ec] ss:$16 sps:$4 sm:$0xff]  }
 0x185   :  { %2691 = vmatprep.subr.bf16.mxu0 %v3958_v43  ;;  %2855 = vmatprep.subr.bf16.mxu1 %v3961_v44  ;;  %v1072_v43 = vmax.f32 %v982_v35, 0.0  ;;  %v4093_v35 = vld [vmem:[#allocation8 + $0x52c] ss:$16 sps:$4 sm:$0xff]  }
 0x188   :  { %2692 = vmatpush1.bf16.msra.mxu0 %v3956_v47  ;;  %2856 = vmatpush1.bf16.msra.mxu1 %v3959_v48  ;;  %v4036_v48 = vld [vmem:[#allocation8 + $0x404] ss:$16 sps:$4 sm:$0xff]  }
 0x189   :  { %2693 = vmatprep.subr.bf16.mxu0 %v3964_v49  ;;  %2857 = vmatprep.subr.bf16.mxu1 %v3967_v23  ;;  %v4039_v49 = vld [vmem:[#allocation8 + $0x40c] ss:$16 sps:$4 sm:$0xff]  }
 0x18c   :  { %2694 = vmatpush1.bf16.msra.mxu0 %v3962_v50  ;;  %2858 = vmatpush1.bf16.msra.mxu1 %v3965_v51  ;;  %v1080_v51 = vpack.c.bf16 %v1072_v43, %v1072_v43  ;;  %v4097_v43 = vld [vmem:[#allocation8 + $0x548] ss:$16 sps:$4 sm:$0xff]  }
 0x18d   :  { %2695 = vmatprep.subr.bf16.mxu0 %v3970_v52  ;;  %2859 = vmatprep.subr.bf16.mxu1 %v3973_v53  ;;  %v4034_v52 = vld [vmem:[#allocation8 + $0x400] ss:$16 sps:$4 sm:$0xff]   ;;  %v4037_v53 = vld [vmem:[#allocation8 + $0x408] ss:$16 sps:$4 sm:$0xff]  }
 0x190   :  { %2696 = vmatpush1.bf16.msra.mxu0 %v3968_v54  ;;  %2860 = vmatpush1.bf16.msra.mxu1 %v3971_v55  ;;  %v4042_v54 = vld [vmem:[#allocation8 + $0x424] ss:$16 sps:$4 sm:$0xff]   ;;  %v4045_v55 = vld [vmem:[#allocation8 + $0x42c] ss:$16 sps:$4 sm:$0xff]  }
 0x191   :  { %2697 = vmatprep.subr.bf16.mxu0 %v3976_v56  ;;  %2861 = vmatprep.subr.bf16.mxu1 %v3979_v57  ;;  %v4040_v57 = vld [vmem:[#allocation8 + $0x420] ss:$16 sps:$4 sm:$0xff]  }
 0x194   :  { %2698 = vmatpush1.bf16.msra.mxu0 %v3974_v58  ;;  %2862 = vmatpush1.bf16.msra.mxu1 %v3977_v59  ;;  %v4043_v58 = vld [vmem:[#allocation8 + $0x428] ss:$16 sps:$4 sm:$0xff]   ;;  %v4048_v59 = vld [vmem:[#allocation8 + $0x444] ss:$16 sps:$4 sm:$0xff]  }
 0x195   :  { %2699 = vmatprep.subr.bf16.mxu0 %v3982_v60  ;;  %2863 = vmatprep.subr.bf16.mxu1 %v3985_v61  ;;  %v4051_v60 = vld [vmem:[#allocation8 + $0x44c] ss:$16 sps:$4 sm:$0xff]  }
 0x198   :  { %2700 = vmatpush1.bf16.msra.mxu0 %v3980_v62  ;;  %2864 = vmatpush1.bf16.msra.mxu1 %v3983_v63 }
 0x199   :  { %2701 = vmatprep.subr.bf16.mxu0 %v3988_v0  ;;  %2865 = vmatprep.subr.bf16.mxu1 %v3991_v1  ;;  %v4046_v0 = vld [vmem:[#allocation8 + $0x440] ss:$16 sps:$4 sm:$0xff]   ;;  %v4049_v1 = vld [vmem:[#allocation8 + $0x448] ss:$16 sps:$4 sm:$0xff]  }
 0x19c   :  { %2702 = vmatpush1.bf16.msra.mxu0 %v3986_v3  ;;  %2866 = vmatpush1.bf16.msra.mxu1 %v3989_v4  ;;  %v4054_v4 = vld [vmem:[#allocation8 + $0x464] ss:$16 sps:$4 sm:$0xff]  }
 0x19d   :  { %2703 = vmatprep.subr.bf16.mxu0 %v3994_v5  ;;  %2867 = vmatprep.subr.bf16.mxu1 %v3997_v6  ;;  %v4057_v5 = vld [vmem:[#allocation8 + $0x46c] ss:$16 sps:$4 sm:$0xff]   ;;  %v4052_v6 = vld [vmem:[#allocation8 + $0x460] ss:$16 sps:$4 sm:$0xff]  }
 0x1a0   :  { %2704 = vmatpush1.bf16.msra.mxu0 %v3992_v7  ;;  %2868 = vmatpush1.bf16.msra.mxu1 %v3995_v8  ;;  %v4055_v7 = vld [vmem:[#allocation8 + $0x468] ss:$16 sps:$4 sm:$0xff]   ;;  %v4060_v8 = vld [vmem:[#allocation8 + $0x484] ss:$16 sps:$4 sm:$0xff]  }
 0x1a1   :  { %2705 = vmatprep.subr.bf16.mxu0 %v4000_v9  ;;  %2869 = vmatprep.subr.bf16.mxu1 %v4003_v14  ;;  %v4063_v9 = vld [vmem:[#allocation8 + $0x48c] ss:$16 sps:$4 sm:$0xff]   ;;  %v4058_v14 = vld [vmem:[#allocation8 + $0x480] ss:$16 sps:$4 sm:$0xff]  }
 0x1a4   :  { %2706 = vmatpush1.bf16.msra.mxu0 %v3998_v15  ;;  %2870 = vmatpush1.bf16.msra.mxu1 %v4001_v16  ;;  %v4061_v15 = vld [vmem:[#allocation8 + $0x488] ss:$16 sps:$4 sm:$0xff]   ;;  %v4066_v16 = vld [vmem:[#allocation8 + $0x4a4] ss:$16 sps:$4 sm:$0xff]  }
 0x1a5   :  { %2707 = vmatprep.subr.bf16.mxu0 %v4006_v17  ;;  %2871 = vmatprep.subr.bf16.mxu1 %v4009_v18  ;;  %v4069_v17 = vld [vmem:[#allocation8 + $0x4ac] ss:$16 sps:$4 sm:$0xff]   ;;  %v4064_v18 = vld [vmem:[#allocation8 + $0x4a0] ss:$16 sps:$4 sm:$0xff]  }
 0x1a8   :  { %2708 = vmatpush1.bf16.msra.mxu0 %v4004_v19  ;;  %2872 = vmatpush1.bf16.msra.mxu1 %v4007_v20  ;;  %v4067_v19 = vld [vmem:[#allocation8 + $0x4a8] ss:$16 sps:$4 sm:$0xff]   ;;  %v4072_v20 = vld [vmem:[#allocation8 + $0x4c4] ss:$16 sps:$4 sm:$0xff]  }
 0x1a9   :  { %2709 = vmatprep.subr.bf16.mxu0 %v4012_v21  ;;  %2873 = vmatprep.subr.bf16.mxu1 %v4015_v22  ;;  %v4075_v21 = vld [vmem:[#allocation8 + $0x4cc] ss:$16 sps:$4 sm:$0xff]   ;;  %v4070_v22 = vld [vmem:[#allocation8 + $0x4c0] ss:$16 sps:$4 sm:$0xff]  }
 0x1ac   :  { %2710 = vmatpush1.bf16.msra.mxu0 %v4010_v26  ;;  %2874 = vmatpush1.bf16.msra.mxu1 %v4013_v27  ;;  %v4073_v26 = vld [vmem:[#allocation8 + $0x4c8] ss:$16 sps:$4 sm:$0xff]   ;;  %v4078_v27 = vld [vmem:[#allocation8 + $0x4e4] ss:$16 sps:$4 sm:$0xff]  }
 0x1ad   :  { %2711 = vmatprep.subr.bf16.mxu0 %v4018_v28  ;;  %2875 = vmatprep.subr.bf16.mxu1 %v4021_v29  ;;  %v4081_v28 = vld [vmem:[#allocation8 + $0x4ec] ss:$16 sps:$4 sm:$0xff]   ;;  %v4076_v29 = vld [vmem:[#allocation8 + $0x4e0] ss:$16 sps:$4 sm:$0xff]  }
 0x1b0   :  { %2712 = vmatpush1.bf16.msra.mxu0 %v4016_v30  ;;  %2876 = vmatpush1.bf16.msra.mxu1 %v4019_v31  ;;  %v4084_v30 = vld [vmem:[#allocation8 + $0x504] ss:$16 sps:$4 sm:$0xff]   ;;  %v4087_v31 = vld [vmem:[#allocation8 + $0x50c] ss:$16 sps:$4 sm:$0xff]  }
 0x1b1   :  { %2713 = vmatprep.subr.bf16.mxu0 %v4024_v33  ;;  %2877 = vmatprep.subr.bf16.mxu1 %v4027_v34  ;;  %v4085_v33 = vld [vmem:[#allocation8 + $0x508] ss:$16 sps:$4 sm:$0xff]   ;;  %v4090_v34 = vld [vmem:[#allocation8 + $0x524] ss:$16 sps:$4 sm:$0xff]  }
 0x1b2   :  { %v4547_v42 = vpop.f32.mrb[4].mxu0 }
 0x1b3   :  { %v1024_v44 = vpop.f32.mrb[5].mxu0 }
 0x1b4   :  { %2714 = vmatpush1.bf16.msra.mxu0 %v4022_v37  ;;  %2878 = vmatpush1.bf16.msra.mxu1 %v4025_v38  ;;  %v1025_v47 = vadd.f32 %v1024_v44, %v249_v39  ;;  %v1026_v36 = vpop.f32.mrb[6].mxu0  ;;  %v4549_v61 = vpop.f32.mrb[4].mxu1  ;;  %v4088_v37 = vld [vmem:[#allocation8 + $0x520] ss:$16 sps:$4 sm:$0xff]   ;;  %v4091_v38 = vld [vmem:[#allocation8 + $0x528] ss:$16 sps:$4 sm:$0xff]  }
 0x1b5   :  { %2715 = vmatprep.subr.bf16.mxu0 %v4030_v40  ;;  %2879 = vmatprep.subr.bf16.mxu1 %v4033_v41  ;;  %v1027_v23 = vpop.f32.mrb[7].mxu0  ;;  %v4551_v62 = vpop.f32.mrb[5].mxu1  ;;  %v4096_v39 = vld [vmem:[#allocation8 + $0x544] ss:$16 sps:$4 sm:$0xff]   ;;  %v4099_v40 = vld [vmem:[#allocation8 + $0x54c] ss:$16 sps:$4 sm:$0xff]  }
 0x1b6   :  { %v1075_v50 = vmax.f32 %v1025_v47, 0.0  ;;  %v1067_v63 = vpop.f32.mrb[6].mxu1  ;;  %v4094_v41 = vld [vmem:[#allocation8 + $0x540] ss:$16 sps:$4 sm:$0xff]   ;;  %v4102_v44 = vld [vmem:[#allocation8 + $0x564] ss:$16 sps:$4 sm:$0xff]  }
 0x1b7   :  { %v1068_v3 = vpop.f32.mrb[7].mxu1  ;;  %v4103_v47 = vld [vmem:[#allocation8 + $0x568] ss:$16 sps:$4 sm:$0xff]   ;;  %v4108_v36 = vld [vmem:[#allocation8 + $0x584] ss:$16 sps:$4 sm:$0xff]  }
 0x1b8   :  { %2716 = vmatpush1.bf16.msra.mxu0 %v4028_v45  ;;  %2880 = vmatpush1.bf16.msra.mxu1 %v4031_v46  ;;  %v1083_v56 = vpack.c.bf16 %v1075_v50, %v1075_v50  ;;  %v4105_v45 = vld [vmem:[#allocation8 + $0x56c] ss:$16 sps:$4 sm:$0xff]   ;;  %v4100_v46 = vld [vmem:[#allocation8 + $0x560] ss:$16 sps:$4 sm:$0xff]   ;;  %v4109_v50 = vld [vmem:[#allocation8 + $0x588] ss:$16 sps:$4 sm:$0xff]  }
 0x1b9   :  { %2726 = vmatprep.subr.bf16.mxu0 %v4036_v48  ;;  %2890 = vmatprep.subr.bf16.mxu1 %v4039_v49  ;;  %v4111_v48 = vld [vmem:[#allocation8 + $0x58c] ss:$16 sps:$4 sm:$0xff]   ;;  %v244_v49 = vsub.s32 4, %v4522_v10  ;;  %v4106_v23 = vld [vmem:[#allocation8 + $0x580] ss:$16 sps:$4 sm:$0xff]  }
 0x1ba   :  { %v4118_v63 = vld [vmem:[#allocation8 + $0x5c0] ss:$16 sps:$4 sm:$0xff]   ;;  %v4129_v3 = vld [vmem:[#allocation8 + $0x5ec] ss:$16 sps:$4 sm:$0xff]  }
 0x1bb   :  { %2718 = vmatmul.mubr.bf16.vlgmr.msra.gmra.mrb[8].mxu0 %v1080_v51  ;;  %2882 = vmatmul.mubr.bf16.vlgmr.msra.gmra.mrb[8].mxu1 %v1080_v51  ;;  %v4114_v51 = vld [vmem:[#allocation8 + $0x5a4] ss:$16 sps:$4 sm:$0xff]  }
 0x1bc   :  { %2727 = vmatpush1.bf16.msra.mxu0 %v4034_v52  ;;  %2891 = vmatpush1.bf16.msra.mxu1 %v4037_v53  ;;  %v4117_v52 = vld [vmem:[#allocation8 + $0x5ac] ss:$16 sps:$4 sm:$0xff]   ;;  %v256_v53 = vsub.s32 7, %v4522_v10 }
 0x1bd   :  { %2728 = vmatprep.subr.bf16.mxu0 %v4042_v54  ;;  %2892 = vmatprep.subr.bf16.mxu1 %v4045_v55  ;;  %v245_v54 = vrot.slane %v4525_v12, %v244_v49  ;;  %v4112_v55 = vld [vmem:[#allocation8 + $0x5a0] ss:$16 sps:$4 sm:$0xff]   ;;  %v4183_v49 = vld [vmem:[#allocation8 + $0x70c] ss:$16 sps:$4 sm:$0xff]  }
 0x1be   :  { %2758 = vmatprep.mubr.bf16.mxu0 %v1083_v56  ;;  %2922 = vmatprep.mubr.bf16.mxu1 %v1083_v56  ;;  %v4115_v56 = vld [vmem:[#allocation8 + $0x5a8] ss:$16 sps:$4 sm:$0xff]  }
 0x1c0   :  { %2729 = vmatpush1.bf16.msra.mxu0 %v4040_v57  ;;  %2893 = vmatpush1.bf16.msra.mxu1 %v4043_v58  ;;  %v4120_v57 = vld [vmem:[#allocation8 + $0x5c4] ss:$16 sps:$4 sm:$0xff]   ;;  %v4123_v58 = vld [vmem:[#allocation8 + $0x5cc] ss:$16 sps:$4 sm:$0xff]  }
 0x1c1   :  { %2730 = vmatprep.subr.bf16.mxu0 %v4048_v59  ;;  %2894 = vmatprep.subr.bf16.mxu1 %v4051_v60  ;;  %v257_v59 = vrot.slane %v4525_v12, %v256_v53  ;;  %v1023_v60 = vadd.f32 %v4547_v42, %v245_v54  ;;  %v4184_v53 = vld [vmem:[#allocation8 + $0x720] ss:$16 sps:$4 sm:$0xff]   ;;  %v4187_v54 = vld [vmem:[#allocation8 + $0x728] ss:$16 sps:$4 sm:$0xff]  }
 0x1c4   :  { %2731 = vmatpush1.bf16.msra.mxu0 %v4046_v0  ;;  %2895 = vmatpush1.bf16.msra.mxu1 %v4049_v1  ;;  %v4121_v0 = vld [vmem:[#allocation8 + $0x5c8] ss:$16 sps:$4 sm:$0xff]   ;;  %v4126_v1 = vld [vmem:[#allocation8 + $0x5e4] ss:$16 sps:$4 sm:$0xff]  }
 0x1c5   :  { %2732 = vmatprep.subr.bf16.mxu0 %v4054_v4  ;;  %2896 = vmatprep.subr.bf16.mxu1 %v4057_v5  ;;  %v1066_v4 = vadd.f32 %v4551_v62, %v257_v59  ;;  %v1074_v5 = vmax.f32 %v1023_v60, 0.0  ;;  %v4198_v59 = vld [vmem:[#allocation8 + $0x764] ss:$16 sps:$4 sm:$0xff]   ;;  %v4201_v60 = vld [vmem:[#allocation8 + $0x76c] ss:$16 sps:$4 sm:$0xff]  }
 0x1c7   :  { %v1077_v42 = vmax.f32 %v1066_v4, 0.0  ;;  %v4202_v4 = vld [vmem:[#allocation8 + $0x780] ss:$16 sps:$4 sm:$0xff]  }
 0x1c8   :  { %2733 = vmatpush1.bf16.msra.mxu0 %v4052_v6  ;;  %2897 = vmatpush1.bf16.msra.mxu1 %v4055_v7  ;;  %v4124_v6 = vld [vmem:[#allocation8 + $0x5e0] ss:$16 sps:$4 sm:$0xff]   ;;  %v4127_v7 = vld [vmem:[#allocation8 + $0x5e8] ss:$16 sps:$4 sm:$0xff]  }
 0x1c9   :  { %2734 = vmatprep.subr.bf16.mxu0 %v4060_v8  ;;  %2898 = vmatprep.subr.bf16.mxu1 %v4063_v9  ;;  %v4132_v8 = vld [vmem:[#allocation8 + $0x604] ss:$16 sps:$4 sm:$0xff]   ;;  %v4135_v9 = vld [vmem:[#allocation8 + $0x60c] ss:$16 sps:$4 sm:$0xff]   ;;  %v1085_v62 = vpack.c.bf16 %v1077_v42, %v1077_v42  ;;  %v4211_v42 = vld [vmem:[#allocation8 + $0x7a8] ss:$16 sps:$4 sm:$0xff]  }
 0x1cc   :  { %2735 = vmatpush1.bf16.msra.mxu0 %v4058_v14  ;;  %2899 = vmatpush1.bf16.msra.mxu1 %v4061_v15  ;;  %v1082_v14 = vpack.c.bf16 %v1074_v5, %v1074_v5  ;;  %v4130_v15 = vld [vmem:[#allocation8 + $0x600] ss:$16 sps:$4 sm:$0xff]   ;;  %v4205_v5 = vld [vmem:[#allocation8 + $0x788] ss:$16 sps:$4 sm:$0xff]  }
 0x1cd   :  { %2736 = vmatprep.subr.bf16.mxu0 %v4066_v16  ;;  %2900 = vmatprep.subr.bf16.mxu1 %v4069_v17  ;;  %v4133_v16 = vld [vmem:[#allocation8 + $0x608] ss:$16 sps:$4 sm:$0xff]   ;;  %v4138_v17 = vld [vmem:[#allocation8 + $0x624] ss:$16 sps:$4 sm:$0xff]  }
 0x1d0   :  { %2737 = vmatpush1.bf16.msra.mxu0 %v4064_v18  ;;  %2901 = vmatpush1.bf16.msra.mxu1 %v4067_v19  ;;  %v4141_v18 = vld [vmem:[#allocation8 + $0x62c] ss:$16 sps:$4 sm:$0xff]   ;;  %v4136_v19 = vld [vmem:[#allocation8 + $0x620] ss:$16 sps:$4 sm:$0xff]  }
 0x1d1   :  { %2738 = vmatprep.subr.bf16.mxu0 %v4072_v20  ;;  %2902 = vmatprep.subr.bf16.mxu1 %v4075_v21  ;;  %v4139_v20 = vld [vmem:[#allocation8 + $0x628] ss:$16 sps:$4 sm:$0xff]   ;;  %v4144_v21 = vld [vmem:[#allocation8 + $0x644] ss:$16 sps:$4 sm:$0xff]  }
 0x1d4   :  { %2739 = vmatpush1.bf16.msra.mxu0 %v4070_v22  ;;  %2903 = vmatpush1.bf16.msra.mxu1 %v4073_v26  ;;  %v4147_v22 = vld [vmem:[#allocation8 + $0x64c] ss:$16 sps:$4 sm:$0xff]   ;;  %v4142_v26 = vld [vmem:[#allocation8 + $0x640] ss:$16 sps:$4 sm:$0xff]  }
 0x1d5   :  { %2740 = vmatprep.subr.bf16.mxu0 %v4078_v27  ;;  %2904 = vmatprep.subr.bf16.mxu1 %v4081_v28  ;;  %v4145_v27 = vld [vmem:[#allocation8 + $0x648] ss:$16 sps:$4 sm:$0xff]   ;;  %v4150_v28 = vld [vmem:[#allocation8 + $0x664] ss:$16 sps:$4 sm:$0xff]  }
 0x1d8   :  { %2741 = vmatpush1.bf16.msra.mxu0 %v4076_v29  ;;  %2905 = vmatpush1.bf16.msra.mxu1 %v4079_v2  ;;  %v4153_v29 = vld [vmem:[#allocation8 + $0x66c] ss:$16 sps:$4 sm:$0xff]   ;;  %v4148_v2 = vld [vmem:[#allocation8 + $0x660] ss:$16 sps:$4 sm:$0xff]  }
 0x1d9   :  { %2742 = vmatprep.subr.bf16.mxu0 %v4084_v30  ;;  %2906 = vmatprep.subr.bf16.mxu1 %v4087_v31  ;;  %v4151_v30 = vld [vmem:[#allocation8 + $0x668] ss:$16 sps:$4 sm:$0xff]   ;;  %v4156_v31 = vld [vmem:[#allocation8 + $0x684] ss:$16 sps:$4 sm:$0xff]  }
 0x1dc   :  { %2743 = vmatpush1.bf16.msra.mxu0 %v4082_v32  ;;  %2907 = vmatpush1.bf16.msra.mxu1 %v4085_v33  ;;  %v4159_v32 = vld [vmem:[#allocation8 + $0x68c] ss:$16 sps:$4 sm:$0xff]   ;;  %v4154_v33 = vld [vmem:[#allocation8 + $0x680] ss:$16 sps:$4 sm:$0xff]  }
 0x1dd   :  { %2744 = vmatprep.subr.bf16.mxu0 %v4090_v34  ;;  %2908 = vmatprep.subr.bf16.mxu1 %v4093_v35  ;;  %v4157_v34 = vld [vmem:[#allocation8 + $0x688] ss:$16 sps:$4 sm:$0xff]   ;;  %v4162_v35 = vld [vmem:[#allocation8 + $0x6a4] ss:$16 sps:$4 sm:$0xff]  }
 0x1e0   :  { %2745 = vmatpush1.bf16.msra.mxu0 %v4088_v37  ;;  %2909 = vmatpush1.bf16.msra.mxu1 %v4091_v38  ;;  %v4165_v37 = vld [vmem:[#allocation8 + $0x6ac] ss:$16 sps:$4 sm:$0xff]   ;;  %v4160_v38 = vld [vmem:[#allocation8 + $0x6a0] ss:$16 sps:$4 sm:$0xff]  }
 0x1e1   :  { %2746 = vmatprep.subr.bf16.mxu0 %v4096_v39  ;;  %2910 = vmatprep.subr.bf16.mxu1 %v4099_v40  ;;  %v4163_v39 = vld [vmem:[#allocation8 + $0x6a8] ss:$16 sps:$4 sm:$0xff]   ;;  %v4168_v40 = vld [vmem:[#allocation8 + $0x6c4] ss:$16 sps:$4 sm:$0xff]  }
 0x1e4   :  { %2747 = vmatpush1.bf16.msra.mxu0 %v4094_v41  ;;  %2911 = vmatpush1.bf16.msra.mxu1 %v4097_v43  ;;  %v4171_v41 = vld [vmem:[#allocation8 + $0x6cc] ss:$16 sps:$4 sm:$0xff]   ;;  %v4166_v43 = vld [vmem:[#allocation8 + $0x6c0] ss:$16 sps:$4 sm:$0xff]  }
 0x1e5   :  { %2748 = vmatprep.subr.bf16.mxu0 %v4102_v44  ;;  %2912 = vmatprep.subr.bf16.mxu1 %v4105_v45  ;;  %v4169_v44 = vld [vmem:[#allocation8 + $0x6c8] ss:$16 sps:$4 sm:$0xff]   ;;  %v4174_v45 = vld [vmem:[#allocation8 + $0x6e4] ss:$16 sps:$4 sm:$0xff]  }
 0x1e8   :  { %2749 = vmatpush1.bf16.msra.mxu0 %v4100_v46  ;;  %2913 = vmatpush1.bf16.msra.mxu1 %v4103_v47  ;;  %v4177_v46 = vld [vmem:[#allocation8 + $0x6ec] ss:$16 sps:$4 sm:$0xff]   ;;  %v4172_v47 = vld [vmem:[#allocation8 + $0x6e0] ss:$16 sps:$4 sm:$0xff]  }
 0x1e9   :  { %2750 = vmatprep.subr.bf16.mxu0 %v4108_v36  ;;  %2914 = vmatprep.subr.bf16.mxu1 %v4111_v48  ;;  %v4175_v36 = vld [vmem:[#allocation8 + $0x6e8] ss:$16 sps:$4 sm:$0xff]   ;;  %v4180_v48 = vld [vmem:[#allocation8 + $0x704] ss:$16 sps:$4 sm:$0xff]  }
 0x1ec   :  { %2751 = vmatpush1.bf16.msra.mxu0 %v4106_v23  ;;  %2915 = vmatpush1.bf16.msra.mxu1 %v4109_v50  ;;  %v4178_v23 = vld [vmem:[#allocation8 + $0x700] ss:$16 sps:$4 sm:$0xff]   ;;  %v4181_v50 = vld [vmem:[#allocation8 + $0x708] ss:$16 sps:$4 sm:$0xff]  }
 0x1ed   :  { %2752 = vmatprep.subr.bf16.mxu0 %v4114_v51  ;;  %2916 = vmatprep.subr.bf16.mxu1 %v4117_v52  ;;  %v4186_v51 = vld [vmem:[#allocation8 + $0x724] ss:$16 sps:$4 sm:$0xff]   ;;  %v4189_v52 = vld [vmem:[#allocation8 + $0x72c] ss:$16 sps:$4 sm:$0xff]  }
 0x1f0   :  { %2753 = vmatpush1.bf16.msra.mxu0 %v4112_v55  ;;  %2917 = vmatpush1.bf16.msra.mxu1 %v4115_v56  ;;  %v4192_v55 = vld [vmem:[#allocation8 + $0x744] ss:$16 sps:$4 sm:$0xff]   ;;  %v4195_v56 = vld [vmem:[#allocation8 + $0x74c] ss:$16 sps:$4 sm:$0xff]  }
 0x1f1   :  { %2754 = vmatprep.subr.bf16.mxu0 %v4120_v57  ;;  %2918 = vmatprep.subr.bf16.mxu1 %v4123_v58  ;;  %v4190_v57 = vld [vmem:[#allocation8 + $0x740] ss:$16 sps:$4 sm:$0xff]   ;;  %v4193_v58 = vld [vmem:[#allocation8 + $0x748] ss:$16 sps:$4 sm:$0xff]  }
 0x1f4   :  { %2755 = vmatpush1.bf16.msra.mxu0 %v4118_v63  ;;  %2919 = vmatpush1.bf16.msra.mxu1 %v4121_v0  ;;  %v4196_v63 = vld [vmem:[#allocation8 + $0x760] ss:$16 sps:$4 sm:$0xff]   ;;  %v4199_v0 = vld [vmem:[#allocation8 + $0x768] ss:$16 sps:$4 sm:$0xff]  }
 0x1f5   :  { %2756 = vmatprep.subr.bf16.mxu0 %v4126_v1  ;;  %2920 = vmatprep.subr.bf16.mxu1 %v4129_v3  ;;  %v4204_v1 = vld [vmem:[#allocation8 + $0x784] ss:$16 sps:$4 sm:$0xff]   ;;  %v4207_v3 = vld [vmem:[#allocation8 + $0x78c] ss:$16 sps:$4 sm:$0xff]  }
 0x1f8   :  { %2757 = vmatpush1.bf16.msra.mxu0 %v4124_v6  ;;  %2921 = vmatpush1.bf16.msra.mxu1 %v4127_v7  ;;  %v252_v6 = vsub.s32 6, %v4522_v10  ;;  %v4210_v7 = vld [vmem:[#allocation8 + $0x7a4] ss:$16 sps:$4 sm:$0xff]  }
 0x1f9   :  { %2767 = vmatprep.subr.bf16.mxu0 %v4132_v8  ;;  %2931 = vmatprep.subr.bf16.mxu1 %v4135_v9  ;;  %v4213_v8 = vld [vmem:[#allocation8 + $0x7ac] ss:$16 sps:$4 sm:$0xff]   ;;  %v4208_v9 = vld [vmem:[#allocation8 + $0x7a0] ss:$16 sps:$4 sm:$0xff]  }
 0x1fb   :  { %2759 = vmatmul.mubr.bf16.vlgmr.msra.gmra.mrb[8].mxu0 %v1082_v14  ;;  %2923 = vmatmul.mubr.bf16.vlgmr.msra.gmra.mrb[8].mxu1 %v1082_v14  ;;  %v253_v14 = vrot.slane %v4525_v12, %v252_v6  ;;  %v4226_v12 = vld [vmem:[#allocation10 + $0x40] sm:$0xff]  }
 0x1fc   :  { %2768 = vmatpush1.bf16.msra.mxu0 %v4130_v15  ;;  %2932 = vmatpush1.bf16.msra.mxu1 %v4133_v16  ;;  %v4216_v15 = vld [vmem:[#allocation8 + $0x7c4] ss:$16 sps:$4 sm:$0xff]   ;;  %v4219_v16 = vld [vmem:[#allocation8 + $0x7cc] ss:$16 sps:$4 sm:$0xff]  }
 0x1fd   :  { %2769 = vmatprep.subr.bf16.mxu0 %v4138_v17  ;;  %2933 = vmatprep.subr.bf16.mxu1 %v4141_v18  ;;  %v4214_v17 = vld [vmem:[#allocation8 + $0x7c0] ss:$16 sps:$4 sm:$0xff]   ;;  %v4217_v18 = vld [vmem:[#allocation8 + $0x7c8] ss:$16 sps:$4 sm:$0xff]  }
 0x1fe   :  { %2799 = vmatprep.mubr.bf16.mxu0 %v1085_v62  ;;  %2963 = vmatprep.mubr.bf16.mxu1 %v1085_v62  ;;  %v1064_v62 = vadd.f32 %v4549_v61, %v253_v14  ;;  %v4230_v61 = vld [vmem:[#allocation10 + $0x48] sm:$0xff]  }
 0x200   :  { %2770 = vmatpush1.bf16.msra.mxu0 %v4136_v19  ;;  %2934 = vmatpush1.bf16.msra.mxu1 %v4139_v20  ;;  %v4222_v19 = vld [vmem:[#allocation8 + $0x7e4] ss:$16 sps:$4 sm:$0xff]   ;;  %v4225_v20 = vld [vmem:[#allocation8 + $0x7ec] ss:$16 sps:$4 sm:$0xff]  }
 0x201   :  { %2771 = vmatprep.subr.bf16.mxu0 %v4144_v21  ;;  %2935 = vmatprep.subr.bf16.mxu1 %v4147_v22  ;;  %v4220_v21 = vld [vmem:[#allocation8 + $0x7e0] ss:$16 sps:$4 sm:$0xff]   ;;  %v4223_v22 = vld [vmem:[#allocation8 + $0x7e8] ss:$16 sps:$4 sm:$0xff]  }
 0x204   :  { %2772 = vmatpush1.bf16.msra.mxu0 %v4142_v26  ;;  %2936 = vmatpush1.bf16.msra.mxu1 %v4145_v27  ;;  %v1076_v26 = vmax.f32 %v1064_v62, 0.0  ;;  %v4227_v27 = vld [vmem:[#allocation10 + $0xc0] sm:$0xff]  }
 0x205   :  { %2773 = vmatprep.subr.bf16.mxu0 %v4150_v28  ;;  %2937 = vmatprep.subr.bf16.mxu1 %v4153_v29  ;;  %v4228_v28 = vld [vmem:[#allocation10] sm:$0xff]  }
 0x206   :  { %v4229_v29 = vld [vmem:[#allocation10 + $0x80] sm:$0xff]  }
 0x208   :  { %2774 = vmatpush1.bf16.msra.mxu0 %v4148_v2  ;;  %2938 = vmatpush1.bf16.msra.mxu1 %v4151_v30  ;;  %v1084_v2 = vpack.c.bf16 %v1076_v26, %v1076_v26  ;;  %v4231_v30 = vld [vmem:[#allocation10 + $0xc8] sm:$0xff]  }
 0x209   :  { %2775 = vmatprep.subr.bf16.mxu0 %v4156_v31  ;;  %2939 = vmatprep.subr.bf16.mxu1 %v4159_v32  ;;  %v4232_v31 = vld [vmem:[#allocation10 + $0x8] sm:$0xff]  }
 0x20a   :  { %v4233_v32 = vld [vmem:[#allocation10 + $0x88] sm:$0xff]  }
 0x20c   :  { %2776 = vmatpush1.bf16.msra.mxu0 %v4154_v33  ;;  %2940 = vmatpush1.bf16.msra.mxu1 %v4157_v34  ;;  %v4234_v33 = vld [vmem:[#allocation10 + $0x50] sm:$0xff]  }
 0x20d   :  { %2777 = vmatprep.subr.bf16.mxu0 %v4162_v35  ;;  %2941 = vmatprep.subr.bf16.mxu1 %v4165_v37  ;;  %v4235_v34 = vld [vmem:[#allocation10 + $0xd0] sm:$0xff]  }
 0x20e   :  { %v4236_v35 = vld [vmem:[#allocation10 + $0x10] sm:$0xff]  }
 0x20f   :  { %v4237_v37 = vld [vmem:[#allocation10 + $0x90] sm:$0xff]  }
 0x210   :  { %2778 = vmatpush1.bf16.msra.mxu0 %v4160_v38  ;;  %2942 = vmatpush1.bf16.msra.mxu1 %v4163_v39  ;;  %v4238_v38 = vld [vmem:[#allocation10 + $0x58] sm:$0xff]  }
 0x211   :  { %2779 = vmatprep.subr.bf16.mxu0 %v4168_v40  ;;  %2943 = vmatprep.subr.bf16.mxu1 %v4171_v41  ;;  %v4239_v39 = vld [vmem:[#allocation10 + $0xd8] sm:$0xff]  }
 0x212   :  { %v4240_v40 = vld [vmem:[#allocation10 + $0x18] sm:$0xff]  }
 0x213   :  { %v4241_v41 = vld [vmem:[#allocation10 + $0x98] sm:$0xff]  }
 0x214   :  { %2780 = vmatpush1.bf16.msra.mxu0 %v4166_v43  ;;  %2944 = vmatpush1.bf16.msra.mxu1 %v4169_v44  ;;  %v4242_v43 = vld [vmem:[#allocation10 + $0x60] sm:$0xff]  }
 0x215   :  { %2781 = vmatprep.subr.bf16.mxu0 %v4174_v45  ;;  %2945 = vmatprep.subr.bf16.mxu1 %v4177_v46  ;;  %v4243_v44 = vld [vmem:[#allocation10 + $0xe0] sm:$0xff]  }
 0x216   :  { %v4244_v45 = vld [vmem:[#allocation10 + $0x20] sm:$0xff]  }
 0x217   :  { %v4245_v46 = vld [vmem:[#allocation10 + $0xa0] sm:$0xff]  }
 0x218   :  { %2782 = vmatpush1.bf16.msra.mxu0 %v4172_v47  ;;  %2946 = vmatpush1.bf16.msra.mxu1 %v4175_v36  ;;  %v4246_v47 = vld [vmem:[#allocation10 + $0x68] sm:$0xff]  }
 0x219   :  { %2783 = vmatprep.subr.bf16.mxu0 %v4180_v48  ;;  %2947 = vmatprep.subr.bf16.mxu1 %v4183_v49  ;;  %v4247_v36 = vld [vmem:[#allocation10 + $0xe8] sm:$0xff]  }
 0x21a   :  { %v4248_v48 = vld [vmem:[#allocation10 + $0x28] sm:$0xff]  }
 0x21b   :  { %v4249_v49 = vld [vmem:[#allocation10 + $0xa8] sm:$0xff]  }
 0x21c   :  { %2784 = vmatpush1.bf16.msra.mxu0 %v4178_v23  ;;  %2948 = vmatpush1.bf16.msra.mxu1 %v4181_v50  ;;  %v4250_v23 = vld [vmem:[#allocation10 + $0x70] sm:$0xff]  }
 0x21d   :  { %2785 = vmatprep.subr.bf16.mxu0 %v4186_v51  ;;  %2949 = vmatprep.subr.bf16.mxu1 %v4189_v52  ;;  %v4251_v50 = vld [vmem:[#allocation10 + $0xf0] sm:$0xff]  }
 0x21e   :  { %v4252_v51 = vld [vmem:[#allocation10 + $0x30] sm:$0xff]  }
 0x21f   :  { %v4253_v52 = vld [vmem:[#allocation10 + $0xb0] sm:$0xff]  }
 0x220   :  { %2786 = vmatpush1.bf16.msra.mxu0 %v4184_v53  ;;  %2950 = vmatpush1.bf16.msra.mxu1 %v4187_v54  ;;  %v4254_v53 = vld [vmem:[#allocation10 + $0x78] sm:$0xff]  }
 0x221   :  { %2787 = vmatprep.subr.bf16.mxu0 %v4192_v55  ;;  %2951 = vmatprep.subr.bf16.mxu1 %v4195_v56  ;;  %v4255_v54 = vld [vmem:[#allocation10 + $0xf8] sm:$0xff]  }
 0x222   :  { %v4256_v55 = vld [vmem:[#allocation10 + $0x38] sm:$0xff]  }
 0x223   :  { %v4257_v56 = vld [vmem:[#allocation10 + $0xb8] sm:$0xff]  }
 0x224   :  { %2788 = vmatpush1.bf16.msra.mxu0 %v4190_v57  ;;  %2952 = vmatpush1.bf16.msra.mxu1 %v4193_v58  ;;  %v1342_v57 = vld [vmem:[%s4592_s4] sm:$0xf] }
 0x225   :  { %2789 = vmatprep.subr.bf16.mxu0 %v4198_v59  ;;  %2953 = vmatprep.subr.bf16.mxu1 %v4201_v60  ;;  %v1347_v58 = vrot.slane %v1342_v57, %v228_v11  ;;  %v1355_v59 = vrot.slane %v1342_v57, %v236_v24  ;;  %v1351_v60 = vrot.slane %v1342_v57, %v232_v13 }
 0x228   :  { %2790 = vmatpush1.bf16.msra.mxu0 %v4196_v63  ;;  %2954 = vmatpush1.bf16.msra.mxu1 %v4199_v0  ;;  %v1359_v63 = vrot.slane %v1342_v57, %v240_v25 }
 0x229   :  { %2791 = vmatprep.subr.bf16.mxu0 %v4204_v1  ;;  %2955 = vmatprep.subr.bf16.mxu1 %v4207_v3 }
 0x22c   :  { %2792 = vmatpush1.bf16.msra.mxu0 %v4202_v4  ;;  %2956 = vmatpush1.bf16.msra.mxu1 %v4205_v5 }
 0x22d   :  { %2793 = vmatprep.subr.bf16.mxu0 %v4210_v7  ;;  %2957 = vmatprep.subr.bf16.mxu1 %v4213_v8 }
 0x230   :  { %2794 = vmatpush1.bf16.msra.mxu0 %v4208_v9  ;;  %2958 = vmatpush1.bf16.msra.mxu1 %v4211_v42 }
 0x231   :  { %2795 = vmatprep.subr.bf16.mxu0 %v4216_v15  ;;  %2959 = vmatprep.subr.bf16.mxu1 %v4219_v16 }
 0x234   :  { %2796 = vmatpush1.bf16.msra.mxu0 %v4214_v17  ;;  %2960 = vmatpush1.bf16.msra.mxu1 %v4217_v18 }
 0x235   :  { %2797 = vmatprep.subr.bf16.mxu0 %v4222_v19  ;;  %2961 = vmatprep.subr.bf16.mxu1 %v4225_v20  ;;  %v3725_v20 = vld [vmem:[%s4594_s6] ss:$0 sm:$0xff] }
 0x238   :  { %2798 = vmatpush1.bf16.msra.mxu0 %v4220_v21  ;;  %2962 = vmatpush1.bf16.msra.mxu1 %v4223_v22 }
 0x239   :  { %3758 = vmatprep.subr.bf16.mxu0 %v4226_v12  ;;  %3780 = vmatprep.subr.bf16.mxu1 %v4227_v27 }
 0x23b   :  { %2800 = vmatmul.mubr.bf16.vlgmr.msra.gmra.mrb[8].mxu0 %v1084_v2  ;;  %2964 = vmatmul.mubr.bf16.vlgmr.msra.gmra.mrb[8].mxu1 %v1084_v2 }
 0x23c   :  { %3759 = vmatpush3.bf16.msra.mxu0 %v4228_v28  ;;  %3781 = vmatpush3.bf16.msra.mxu1 %v4229_v29 }
 0x23d   :  { %3760 = vmatprep.subr.bf16.mxu0 %v4230_v61  ;;  %3782 = vmatprep.subr.bf16.mxu1 %v4231_v30 }
 0x240   :  { %3761 = vmatpush3.bf16.msra.mxu0 %v4232_v31  ;;  %3783 = vmatpush3.bf16.msra.mxu1 %v4233_v32 }
 0x241   :  { %3762 = vmatprep.subr.bf16.mxu0 %v4234_v33  ;;  %3784 = vmatprep.subr.bf16.mxu1 %v4235_v34 }
 0x244   :  { %3763 = vmatpush3.bf16.msra.mxu0 %v4236_v35  ;;  %3785 = vmatpush3.bf16.msra.mxu1 %v4237_v37 }
 0x245   :  { %3764 = vmatprep.subr.bf16.mxu0 %v4238_v38  ;;  %3786 = vmatprep.subr.bf16.mxu1 %v4239_v39 }
 0x248   :  { %3765 = vmatpush3.bf16.msra.mxu0 %v4240_v40  ;;  %3787 = vmatpush3.bf16.msra.mxu1 %v4241_v41 }
 0x249   :  { %3766 = vmatprep.subr.bf16.mxu0 %v4242_v43  ;;  %3788 = vmatprep.subr.bf16.mxu1 %v4243_v44 }
 0x24c   :  { %3767 = vmatpush3.bf16.msra.mxu0 %v4244_v45  ;;  %3789 = vmatpush3.bf16.msra.mxu1 %v4245_v46 }
 0x24d   :  { %3768 = vmatprep.subr.bf16.mxu0 %v4246_v47  ;;  %3790 = vmatprep.subr.bf16.mxu1 %v4247_v36 }
 0x250   :  { %3769 = vmatpush3.bf16.msra.mxu0 %v4248_v48  ;;  %3791 = vmatpush3.bf16.msra.mxu1 %v4249_v49 }
 0x251   :  { %3770 = vmatprep.subr.bf16.mxu0 %v4250_v23  ;;  %3792 = vmatprep.subr.bf16.mxu1 %v4251_v50 }
 0x254   :  { %3771 = vmatpush3.bf16.msra.mxu0 %v4252_v51  ;;  %3793 = vmatpush3.bf16.msra.mxu1 %v4253_v52 }
 0x255   :  { %3772 = vmatprep.subr.bf16.mxu0 %v4254_v53  ;;  %3794 = vmatprep.subr.bf16.mxu1 %v4255_v54 }
 0x258   :  { %3773 = vmatpush3.bf16.msra.mxu0 %v4256_v55  ;;  %3795 = vmatpush3.bf16.msra.mxu1 %v4257_v56 }
 0x30e   :  { %v2801_v0 = vpop.f32.mrb[8].mxu0  ;;  %v2965_v1 = vpop.f32.mrb[8].mxu1 }
 0x30f   :  { %v3802_v3 = vadd.f32 %v2801_v0, %v1347_v58  ;;  %v3804_v4 = vadd.f32 %v2965_v1, %v1355_v59  ;;  %v2803_v5 = vpop.f32.mrb[9].mxu0  ;;  %v2967_v6 = vpop.f32.mrb[9].mxu1 }
 0x310   :  { %v3803_v7 = vadd.f32 %v2803_v5, %v1351_v60  ;;  %v3805_v8 = vadd.f32 %v2967_v6, %v1359_v63  ;;  %v2805_v9 = vpop.f32.mrb[10].mxu0  ;;  %v2969_v42 = vpop.f32.mrb[10].mxu1 }
 0x311   :  { %v2972_v11 = vmax.f32 %v3802_v3, 0.0  ;;  %v2974_v14 = vmax.f32 %v3804_v4, 0.0  ;;  %v2806_v15 = vpop.f32.mrb[11].mxu0  ;;  %v2970_v24 = vpop.f32.mrb[11].mxu1 }
 0x312   :  { %v2973_v16 = vmax.f32 %v3803_v7, 0.0  ;;  %v2975_v17 = vmax.f32 %v3805_v8, 0.0 }
 0x313   :  { %v2976_v10 = vpack.c.bf16 %v2972_v11, %v2972_v11  ;;  %v2978_v25 = vpack.c.bf16 %v2974_v14, %v2974_v14 }
 0x314   :  { %v2977_v13 = vpack.c.bf16 %v2973_v16, %v2973_v16  ;;  %v2979_v18 = vpack.c.bf16 %v2975_v17, %v2975_v17 }
 0x316   :  { %3275 = vmatprep.mubr.bf16.mxu0 %v2977_v13  ;;  %3315 = vmatprep.mubr.bf16.mxu1 %v2979_v18 }
 0x317   :  { %3276 = vmatmul.mubr.bf16.vlgmr.msra.gmra.mrb[12].mxu0 %v2976_v10  ;;  %3316 = vmatmul.mubr.bf16.vlgmr.msra.gmra.mrb[12].mxu1 %v2978_v25 }
 0x3ea   :  { %v3774_v62 = vpop.f32.mrb[12].mxu0  ;;  %v3796_v19 = vpop.f32.mrb[12].mxu1 }
 0x3eb   :  { %v3775_v21 = vpop.f32.mrb[13].mxu0  ;;  %v3797_v22 = vpop.f32.mrb[13].mxu1 }
 0x3ec   :  { %v3776_v26 = vadd.f32 %v3775_v21, %v3774_v62  ;;  %v3798_v12 = vadd.f32 %v3797_v22, %v3796_v19  ;;  %v3777_v27 = vpop.f32.mrb[14].mxu0  ;;  %v3799_v28 = vpop.f32.mrb[14].mxu1 }
 0x3ed   :  { %v3778_v29 = vpop.f32.mrb[15].mxu0  ;;  %v3800_v2 = vpop.f32.mrb[15].mxu1 }
 0x3ee   :  { %v3278_v61 = vadd.f32 %v3776_v26, %v3725_v20 }
 0x3f0   :  { %v3318_v30 = vadd.f32 %v3798_v12, %v3278_v61 }
 0x3f2   :  { %3323 = vst [vmem:[#allocation11] sm:$0xff] %v3318_v30 }
 0x3f3   :  { %4379 = shalt.err (!%p4376_p2)
}
 0x3f4   :  { %s4380_s21 = scalar_lea.hbm %s4595_s7, 128 }
 0x3f5   :  { %p4381_p3 = scmp.ne.s32.totalorder %s4595_s7, %s4380_s21  ;;  %p4384_p4 = scmp.lt.u32.totalorder %s4380_s21, %s4595_s7 }
 0x3f7   :  { %p4386_p5 = pnand %p4384_p4, %p4381_p3 }
 0x3f9   :  { %4389 = shalt.err (!%p4386_p5)
}
 0x3fa   :  { %3333 = dma.vmem_to_hbm [thread:$0]  %s3331_s18, 128, %s4595_s7, [#allocation4]  }
 0x3fb   :  { %4396 = dma.done.wait [#allocation4], 128  }
 0x3fc   :  { %4397 = vsyncadd [#allocation4], 4294967168 }
 0x3fd   :  { %3337 = vsyncpa [#allocation3], 1 }
 0x3fe   :  { %3338 = vsyncpa [#allocation6], 1 }
 0x3ff   :  { %3339 = vsyncpa [#allocation9], 1 }
 0x400   :  { %3340 = vsyncpa [#allocation4], 1 }

</bundles_post_ra>
